<compile_context>
chip_gen: v7x
topology: tpu7x:2x2x1
jax: 0.10.0
libtpu: 0.0.40
codegen_flags: <defaults>
</compile_context>

<pallas_src>
import numpy as np
import jax
import jax.numpy as jnp
from jax.experimental import pallas as pl
from jax.experimental.pallas import tpu as pltpu

# ----------------------------- hyperparameters ------------------------------
B = 2              # batch
C = 3              # image channels
H_IMG = 32
W_IMG = 32
PATCH = 16
N_PATCH = (H_IMG // PATCH) * (W_IMG // PATCH)   # 4 patch tokens
T = N_PATCH + 1                                 # + cls token = 5
T_PAD = 8                                       # sublane-padded tokens/batch
BT = B * T_PAD                                  # 16 rows (2 sublane tiles)
D = 32             # feature_dim (synthetic stand-in for 768)
NUM_HEADS = 2
HEAD_DIM = D // NUM_HEADS
MLP_DIM = 4 * D                                 # 128 (lane-dense)
DEPTH = 2
NUM_CLASSES = 5
CLS_PAD = 128                                   # lane-dense classifier output
OUT_ROWS = 8                                    # full (8,128) output tile
LANE = 128
LN_EPS = 1e-6
_GELU_C = 0.7978845608028654                    # sqrt(2/pi)
_EXP_CLAMP = 80.0                               # f32 exp overflow guard


# ----------------------- packed-parameter slab layout ------------------------
# Every sub-array starts on an 8-sublane boundary and is lane-padded to 128 so
# in-kernel static slices are cheap (no tile-boundary crossings).
def _build_layout():
    off, cur = {}, 0

    def alloc(name, rows):
        nonlocal cur
        off[name] = cur
        cur += -(-rows // 8) * 8        # round rows up to a multiple of 8

    for d in range(DEPTH):
        alloc(f"wqkv{d}", D)            # (32, 96)
        alloc(f"wproj{d}", D)           # (32, 32)
        alloc(f"wfc1{d}", D)            # (32, 128)
        alloc(f"wfc2{d}", MLP_DIM)      # (128, 32)
    alloc("cls_w", D)                   # (32, 128)
    alloc("tok_tmpl", BT)               # (16, 32)
    alloc("attn_mask", BT)              # (16, 16)
    alloc("pool", OUT_ROWS)             # (8, 16)
    alloc("vecs", DEPTH * 8 + 3)        # 19 single-row vectors (pads to 24)
    return off, cur


_OFF, SLAB_ROWS = _build_layout()
_VEC0 = _OFF["vecs"]
_VROWS_PER_BLOCK = 8                    # vector rows per transformer block


# ------------------------------ math helpers --------------------------------
def _layer_norm(x, g, b):
    mu = jnp.mean(x, axis=-1, keepdims=True)
    xc = x - mu
    var = jnp.mean(xc * xc, axis=-1, keepdims=True)
    return xc * jax.lax.rsqrt(var + LN_EPS) * g + b


def _gelu(x):
    # tanh approximation (EUP-friendly)
    # TODO(synk): real DINO/timm MLPs use exact erf GELU; tanh approx is kept
    # here and in the in-script reference so both sides match.
    return 0.5 * x * (1.0 + jnp.tanh(_GELU_C * (x + 0.044715 * x * x * x)))


# ------------------------------ fused Pallas kernel --------------------------
def _dino_fused_kernel(patches_ref, patch_w_ref, slab_ref, o_ref):
    f32 = jnp.float32

    def vec(row, width):                       # packed (1, width) vector
        r = _VEC0 + row
        return slab_ref[r:r + 1, :width]

    def mat(name, rows, cols):                 # packed (rows, cols) matrix
        r = _OFF[name]
        return slab_ref[r:r + rows, :cols]

    # Patch embedding.  cls/pos/conv-bias are folded into the token template;
    # the padded patch matrix has zero rows for cls/pad positions, so the
    # matmul only contributes to patch-token rows.
    x = mat("tok_tmpl", BT, D) + jnp.dot(
        patches_ref[...], patch_w_ref[...], preferred_element_type=f32)  # (BT, D)

    # Multiplicative key mask: 1 for valid keys of the same batch block,
    # 0 for padded / cross-batch keys.
    mask = mat("attn_mask", BT, BT)                                      # (BT, BT)

    # DEPTH pre-norm transformer blocks, fully unrolled (tiny DEPTH=2);
    # all weights resident in VMEM, statically indexed per block.
    for d in range(DEPTH):
        vb = d * _VROWS_PER_BLOCK

        # ---- multi-head self-attention: ONE fused qkv matmul, per-head
        # softmax over the whole padded batch (block-diagonal mask), head
        # contexts lane-concatenated into ONE wproj matmul. ----
        h = _layer_norm(x, vec(vb + 0, D), vec(vb + 1, D))
        qkv = (jnp.dot(h, mat(f"wqkv{d}", D, 3 * D), preferred_element_type=f32)
               + vec(vb + 2, 3 * D))                                     # (BT, 96)
        ctxs = []
        for n in range(NUM_HEADS):
            q = qkv[:, n * HEAD_DIM:(n + 1) * HEAD_DIM]
            k = qkv[:, D + n * HEAD_DIM:D + (n + 1) * HEAD_DIM]
            v = qkv[:, 2 * D + n * HEAD_DIM:2 * D + (n + 1) * HEAD_DIM]
            # scores: contract head_dim directly (no explicit k.T);
            # 1/sqrt(head_dim) already folded into the q columns/bias.
            s = jax.lax.dot_general(q, k, (((1,), (1,)), ((), ())),
                                    preferred_element_type=f32)          # (BT, BT)
            # Short softmax chain: no row-max subtraction; the clamp guards
            # f32 exp overflow (inactive at this controlled weight scale) and
            # the multiplicative mask zeroes invalid keys exactly.
            p = jnp.exp(jnp.minimum(s, _EXP_CLAMP)) * mask
            p = p * pl.reciprocal(jnp.sum(p, axis=-1, keepdims=True), approx=True)
            ctxs.append(jnp.dot(p, v, preferred_element_type=f32))       # (BT, HD)
        ctx = jnp.concatenate(ctxs, axis=-1)                             # (BT, D)
        x = x + (jnp.dot(ctx, mat(f"wproj{d}", D, D), preferred_element_type=f32)
                 + vec(vb + 3, D))

        # ---- MLP ----
        h2 = _layer_norm(x, vec(vb + 4, D), vec(vb + 5, D))
        h2 = (jnp.dot(h2, mat(f"wfc1{d}", D, MLP_DIM), preferred_element_type=f32)
              + vec(vb + 6, MLP_DIM))
        h2 = _gelu(h2)
        x = x + (jnp.dot(h2, mat(f"wfc2{d}", MLP_DIM, D), preferred_element_type=f32)
                 + vec(vb + 7, D))

    # Final LayerNorm -> x_norm_patchtokens -> mean(dim=1) (pooling matmul,
    # rows >= B are zero so the output is a full (8,128) tile) -> classifier.
    gvb = DEPTH * _VROWS_PER_BLOCK
    xn = _layer_norm(x, vec(gvb + 0, D), vec(gvb + 1, D))
    feat = jnp.dot(mat("pool", OUT_ROWS, BT), xn,
                   preferred_element_type=f32)                           # (8, D)
    o_ref[...] = (jnp.dot(feat, mat("cls_w", D, CLS_PAD),
                          preferred_element_type=f32)
                  + vec(gvb + 2, CLS_PAD))                               # (8, 128)


def _dino_fused_call(patches_pad, kp):
    vmem = pl.BlockSpec(memory_space=pltpu.MemorySpace.VMEM)
    return pl.pallas_call(
        _dino_fused_kernel,
        out_shape=jax.ShapeDtypeStruct((OUT_ROWS, CLS_PAD), jnp.float32),
        in_specs=[vmem, vmem, vmem],
        out_specs=vmem,
    )(patches_pad, kp["patch_w"], kp["slab"])


def modified_dino_forward(x_nchw, kp):
    """Full ModifiedDINO forward: image (NCHW) -> logits (B, NUM_CLASSES)."""
    bq, cq, hq, wq_ = x_nchw.shape
    gh, gw = hq // PATCH, wq_ // PATCH
    # Unfold PxP patches exactly like Conv2d(kernel=stride=PATCH) in NCHW,
    # then zero-pad the token axis to T_PAD so each batch owns a full
    # sublane-aligned 8-row block inside the fused kernel.
    p = x_nchw.reshape(bq, cq, gh, PATCH, gw, PATCH)
    p = p.transpose(0, 2, 4, 1, 3, 5).reshape(bq, gh * gw, cq * PATCH * PATCH)
    p = jnp.pad(p, ((0, 0), (0, T_PAD - N_PATCH), (0, 0)))
    patches_pad = p.reshape(bq * T_PAD, cq * PATCH * PATCH)
    logits_pad = _dino_fused_call(patches_pad, kp)
    return logits_pad[:B, :NUM_CLASSES]


# ------------------------- parameter repacking (one-time) --------------------
def prepare_kernel_params(params):
    """Repack ModifiedDINO params into one tile-aligned (rows,128) slab."""
    scale = 1.0 / float(np.sqrt(HEAD_DIM))
    slab = np.zeros((SLAB_ROWS, LANE), np.float32)

    def put(name, a):
        a = np.asarray(a, np.float32)
        r = _OFF[name]
        slab[r:r + a.shape[0], :a.shape[1]] = a

    def put_vec(row, a):
        a = np.asarray(a, np.float32).reshape(1, -1)
        slab[_VEC0 + row, :a.shape[1]] = a[0]

    for d, (l1g, l1b, wqkv, bqkv, wp, bp, l2g, l2b,
            w1, b1, w2, b2) in enumerate(params["blocks"]):
        wqkv = np.asarray(wqkv, np.float32).copy()
        bqkv = np.asarray(bqkv, np.float32).copy()
        # fold 1/sqrt(head_dim) into the q projection (weight + bias)
        wqkv[:, :D] *= scale
        bqkv[:, :D] *= scale
        put(f"wqkv{d}", wqkv)
        put(f"wproj{d}", wp)
        put(f"wfc1{d}", w1)
        put(f"wfc2{d}", w2)
        vb = d * _VROWS_PER_BLOCK
        put_vec(vb + 0, l1g)
        put_vec(vb + 1, l1b)
        put_vec(vb + 2, bqkv)
        put_vec(vb + 3, bp)
        put_vec(vb + 4, l2g)
        put_vec(vb + 5, l2b)
        put_vec(vb + 6, b1)
        put_vec(vb + 7, b2)

    gvb = DEPTH * _VROWS_PER_BLOCK
    put_vec(gvb + 0, params["norm_g"])
    put_vec(gvb + 1, params["norm_b"])
    put_vec(gvb + 2, np.pad(np.asarray(params["cls_b"], np.float32),
                            ((0, 0), (0, CLS_PAD - NUM_CLASSES))))

    # Lane-dense classifier weight (zero-padded NUM_CLASSES -> 128 columns).
    put("cls_w", np.pad(np.asarray(params["cls_w"], np.float32),
                        ((0, 0), (0, CLS_PAD - NUM_CLASSES))))

    # Token template: per batch block, rows [0, N_PATCH) = pos-embed + conv
    # bias for patch tokens, row N_PATCH = cls-token + pos-embed, rest = zero
    # padding.  (In-kernel token order is [patches..., cls, pad...]; semantics
    # are unchanged since pos-embeds travel with their tokens and attention is
    # order-invariant.)
    pos = np.asarray(params["pos_embed"], np.float32)[0]            # (T, D)
    patch_rows = pos[1:T] + np.asarray(params["patch_b"], np.float32)
    cls_row = np.asarray(params["cls_token"], np.float32)[0, 0][None, :] + pos[0:1]
    pad_rows = np.zeros((T_PAD - T, D), np.float32)
    per_batch = np.concatenate([patch_rows, cls_row, pad_rows], axis=0)
    put("tok_tmpl", np.tile(per_batch, (B, 1)))

    # Multiplicative block-diagonal attention key mask over the padded axis.
    qi = np.arange(BT)[:, None]
    ki = np.arange(BT)[None, :]
    valid = (qi // T_PAD == ki // T_PAD) & ((ki % T_PAD) < T)
    put("attn_mask", valid.astype(np.float32))

    # Patch-token mean-pooling matrix, padded to 8 output rows (rows >= B
    # are zero) so the kernel's final store is a full (8,128) tile.
    pool = np.zeros((OUT_ROWS, BT), np.float32)
    bi = np.arange(B)[:, None]
    mi = np.arange(BT)[None, :]
    is_patch = (mi // T_PAD == bi) & ((mi % T_PAD) < N_PATCH)
    pool[:B] = np.where(is_patch, 1.0 / N_PATCH, 0.0)
    put("pool", pool)

    return {"patch_w": jnp.asarray(params["patch_w"], jnp.float32),
            "slab": jnp.asarray(slab)}


# ------------------------------- parameters ---------------------------------
def init_params(key):
    ks = jax.random.split(key, 8 + DEPTH)
    params = {
        "patch_w": 0.02 * jax.random.normal(
            ks[0], (C * PATCH * PATCH, D), jnp.float32),
        "patch_b": jnp.zeros((1, D), jnp.float32),
        "cls_token": 0.02 * jax.random.normal(ks[1], (1, 1, D), jnp.float32),
        "pos_embed": 0.02 * jax.random.normal(ks[2], (1, T, D), jnp.float32),
        "norm_g": jnp.ones((1, D), jnp.float32),
        "norm_b": jnp.zeros((1, D), jnp.float32),
        "cls_w": 0.05 * jax.random.normal(ks[3], (D, NUM_CLASSES), jnp.float32),
        "cls_b": jnp.zeros((1, NUM_CLASSES), jnp.float32),
        "blocks": [],
    }
    for d in range(DEPTH):
        bk = jax.random.split(ks[4 + d], 4)
        params["blocks"].append((
            jnp.ones((1, D), jnp.float32),                              # ln1_g
            jnp.zeros((1, D), jnp.float32),                             # ln1_b
            0.05 * jax.random.normal(bk[0], (D, 3 * D), jnp.float32),   # w_qkv
            jnp.zeros((1, 3 * D), jnp.float32),                         # b_qkv
            0.05 * jax.random.normal(bk[1], (D, D), jnp.float32),       # w_proj
            jnp.zeros((1, D), jnp.float32),                             # b_proj
            jnp.ones((1, D), jnp.float32),                              # ln2_g
            jnp.zeros((1, D), jnp.float32),                             # ln2_b
            0.05 * jax.random.normal(bk[2], (D, MLP_DIM), jnp.float32), # w_fc1
            jnp.zeros((1, MLP_DIM), jnp.float32),                       # b_fc1
            0.05 * jax.random.normal(bk[3], (MLP_DIM, D), jnp.float32), # w_fc2
            jnp.zeros((1, D), jnp.float32),                             # b_fc2
        ))
    return params


# -------------------------- plain-JAX reference ------------------------------
def reference_forward(x_nchw, params):
    bq, cq, hq, wq = x_nchw.shape
    gh, gw = hq // PATCH, wq // PATCH
    patches = x_nchw.reshape(bq, cq, gh, PATCH, gw, PATCH)
    patches = patches.transpose(0, 2, 4, 1, 3, 5).reshape(bq * gh * gw, -1)
    emb = (patches @ params["patch_w"] + params["patch_b"]).reshape(bq, gh * gw, D)
    cls = jnp.broadcast_to(params["cls_token"], (bq, 1, D))
    x = jnp.concatenate([cls, emb], axis=1) + params["pos_embed"]
    for (ln1g, ln1b, wqkv, bqkv, wproj, bproj,
         ln2g, ln2b, wfc1, bfc1, wfc2, bfc2) in params["blocks"]:
        h = _layer_norm(x, ln1g, ln1b)
        qkv = h @ wqkv + bqkv
        q, k, v = qkv[..., :D], qkv[..., D:2 * D], qkv[..., 2 * D:]

        def split(a):
            return a.reshape(bq, T, NUM_HEADS, HEAD_DIM).transpose(0, 2, 1, 3)

        qh, kh, vh = split(q), split(k), split(v)
        s = jnp.einsum("bhqd,bhkd->bhqk", qh, kh) / np.sqrt(HEAD_DIM)
        p = jax.nn.softmax(s, axis=-1)
        a = jnp.einsum("bhqk,bhkd->bhqd", p, vh)
        a = a.transpose(0, 2, 1, 3).reshape(bq, T, D)
        x = x + (a @ wproj + bproj)
        h2 = _layer_norm(x, ln2g, ln2b)
        h2 = _gelu(h2 @ wfc1 + bfc1) @ wfc2 + bfc2
        x = x + h2
    xn = _layer_norm(x, params["norm_g"], params["norm_b"])
    feat = xn[:, 1:, :].mean(axis=1)
    return feat @ params["cls_w"] + params["cls_b"]


# ----------------------------------- main ------------------------------------
if __name__ == "__main__":
    key = jax.random.PRNGKey(0)
    pkey, xkey = jax.random.split(key)
    params = init_params(pkey)
    x = jax.random.normal(xkey, (B, C, H_IMG, W_IMG), dtype=jnp.float32)

    kparams = prepare_kernel_params(params)     # one-time weight repacking
    fwd = jax.jit(modified_dino_forward)
    logits = jax.block_until_ready(fwd(x, kparams))

    assert logits.shape == (B, NUM_CLASSES)
    ref = reference_forward(x, params)
    # tolerance covers the EUP approximate reciprocal used in the softmax
    assert np.allclose(np.asarray(logits), np.asarray(ref),
                       rtol=1e-2, atol=1e-2), "Pallas output != JAX reference"
    print("KERNEL_OK")
</pallas_src>

<mosaic_0001>
module attributes {stable_mosaic.version = 11 : i64} {
  func.func @_dino_fused_kernel(%arg0: memref<16x768xf32, #tpu.memory_space<vmem>>, %arg1: memref<768x32xf32, #tpu.memory_space<vmem>>, %arg2: memref<544x128xf32, #tpu.memory_space<vmem>>, %arg3: memref<8x128xf32, #tpu.memory_space<vmem>>) attributes {dimension_semantics = [], scalar_prefetch = 0 : i64, scratch_operands = 0 : i64, tpu.core_type = #tpu.core_type<tc>} {
    %c480 = arith.constant 480 : index
    %c0 = arith.constant 0 : index
    %0 = vector.load %arg2[%c480, %c0] : memref<544x128xf32, #tpu.memory_space<vmem>>, vector<16x32xf32>
    %c0_0 = arith.constant 0 : index
    %c0_1 = arith.constant 0 : index
    %1 = vector.load %arg0[%c0_0, %c0_1] : memref<16x768xf32, #tpu.memory_space<vmem>>, vector<16x768xf32>
    %c0_2 = arith.constant 0 : index
    %c0_3 = arith.constant 0 : index
    %2 = vector.load %arg1[%c0_2, %c0_3] : memref<768x32xf32, #tpu.memory_space<vmem>>, vector<768x32xf32>
    %cst = arith.constant dense<0.000000e+00> : vector<16x32xf32>
    %3 = tpu.matmul %1, %2, %cst {dimension_numbers = #tpu.dot_dimension_numbers<[1], [0], [0], [1], [0, 0, 1, 1], [], []>} : vector<16x768xf32>, vector<768x32xf32>, vector<16x32xf32> -> vector<16x32xf32>
    %4 = arith.addf %0, %3 : vector<16x32xf32>
    %c496 = arith.constant 496 : index
    %c0_4 = arith.constant 0 : index
    %5 = vector.load %arg2[%c496, %c0_4] : memref<544x128xf32, #tpu.memory_space<vmem>>, vector<16x16xf32>
    %c520 = arith.constant 520 : index
    %c0_5 = arith.constant 0 : index
    %6 = vector.load %arg2[%c520, %c0_5] : memref<544x128xf32, #tpu.memory_space<vmem>>, vector<1x32xf32>
    %c521 = arith.constant 521 : index
    %c0_6 = arith.constant 0 : index
    %7 = vector.load %arg2[%c521, %c0_6] : memref<544x128xf32, #tpu.memory_space<vmem>>, vector<1x32xf32>
    %cst_7 = arith.constant dense<0.000000e+00> : vector<16xf32>
    %8 = vector.multi_reduction <add>, %4, %cst_7 [1] : vector<16x32xf32> to vector<16xf32>
    %9 = vector.shape_cast %8 : vector<16xf32> to vector<16x1xf32>
    %cst_8 = arith.constant 3.200000e+01 : f32
    %10 = vector.broadcast %cst_8 : f32 to vector<16x1xf32>
    %11 = arith.divf %9, %10 : vector<16x1xf32>
    %12 = vector.broadcast %11 : vector<16x1xf32> to vector<16x32xf32>
    %13 = arith.subf %4, %12 : vector<16x32xf32>
    %14 = arith.mulf %13, %13 : vector<16x32xf32>
    %cst_9 = arith.constant dense<0.000000e+00> : vector<16xf32>
    %15 = vector.multi_reduction <add>, %14, %cst_9 [1] : vector<16x32xf32> to vector<16xf32>
    %16 = vector.shape_cast %15 : vector<16xf32> to vector<16x1xf32>
    %cst_10 = arith.constant 3.200000e+01 : f32
    %17 = vector.broadcast %cst_10 : f32 to vector<16x1xf32>
    %18 = arith.divf %16, %17 : vector<16x1xf32>
    %cst_11 = arith.constant 9.99999997E-7 : f32
    %19 = vector.broadcast %cst_11 : f32 to vector<16x1xf32>
    %20 = arith.addf %18, %19 : vector<16x1xf32>
    %21 = math.rsqrt %20 : vector<16x1xf32>
    %22 = vector.broadcast %21 : vector<16x1xf32> to vector<16x32xf32>
    %23 = arith.mulf %13, %22 : vector<16x32xf32>
    %24 = vector.broadcast %6 : vector<1x32xf32> to vector<16x32xf32>
    %25 = arith.mulf %23, %24 : vector<16x32xf32>
    %26 = vector.broadcast %7 : vector<1x32xf32> to vector<16x32xf32>
    %27 = arith.addf %25, %26 : vector<16x32xf32>
    %c0_12 = arith.constant 0 : index
    %c0_13 = arith.constant 0 : index
    %28 = vector.load %arg2[%c0_12, %c0_13] : memref<544x128xf32, #tpu.memory_space<vmem>>, vector<32x96xf32>
    %cst_14 = arith.constant dense<0.000000e+00> : vector<16x96xf32>
    %29 = tpu.matmul %27, %28, %cst_14 {dimension_numbers = #tpu.dot_dimension_numbers<[1], [0], [0], [1], [0, 0, 1, 1], [], []>} : vector<16x32xf32>, vector<32x96xf32>, vector<16x96xf32> -> vector<16x96xf32>
    %c522 = arith.constant 522 : index
    %c0_15 = arith.constant 0 : index
    %30 = vector.load %arg2[%c522, %c0_15] : memref<544x128xf32, #tpu.memory_space<vmem>>, vector<1x96xf32>
    %31 = vector.broadcast %30 : vector<1x96xf32> to vector<16x96xf32>
    %32 = arith.addf %29, %31 : vector<16x96xf32>
    %33 = vector.extract_strided_slice %32 {offsets = [0, 0], sizes = [16, 16], strides = [1, 1]} : vector<16x96xf32> to vector<16x16xf32>
    %34 = vector.extract_strided_slice %32 {offsets = [0, 32], sizes = [16, 16], strides = [1, 1]} : vector<16x96xf32> to vector<16x16xf32>
    %35 = vector.extract_strided_slice %32 {offsets = [0, 64], sizes = [16, 16], strides = [1, 1]} : vector<16x96xf32> to vector<16x16xf32>
    %cst_16 = arith.constant dense<0.000000e+00> : vector<16x16xf32>
    %36 = tpu.matmul %33, %34, %cst_16 {dimension_numbers = #tpu.dot_dimension_numbers<[1], [1], [0], [0], [0, 0, 1, 0], [], []>} : vector<16x16xf32>, vector<16x16xf32>, vector<16x16xf32> -> vector<16x16xf32>
    %cst_17 = arith.constant 8.000000e+01 : f32
    %37 = vector.broadcast %cst_17 : f32 to vector<16x16xf32>
    %38 = arith.minimumf %36, %37 : vector<16x16xf32>
    %39 = math.exp %38 : vector<16x16xf32>
    %40 = arith.mulf %39, %5 : vector<16x16xf32>
    %cst_18 = arith.constant dense<0.000000e+00> : vector<16xf32>
    %41 = vector.multi_reduction <add>, %40, %cst_18 [1] : vector<16x16xf32> to vector<16xf32>
    %42 = vector.shape_cast %41 : vector<16xf32> to vector<16x1xf32>
    %43 = tpu.reciprocal %42 {approx = true} : vector<16x1xf32> -> vector<16x1xf32>
    %44 = vector.broadcast %43 : vector<16x1xf32> to vector<16x16xf32>
    %45 = arith.mulf %40, %44 : vector<16x16xf32>
    %cst_19 = arith.constant dense<0.000000e+00> : vector<16x16xf32>
    %46 = tpu.matmul %45, %35, %cst_19 {dimension_numbers = #tpu.dot_dimension_numbers<[1], [0], [0], [1], [0, 0, 1, 1], [], []>} : vector<16x16xf32>, vector<16x16xf32>, vector<16x16xf32> -> vector<16x16xf32>
    %47 = vector.extract_strided_slice %32 {offsets = [0, 16], sizes = [16, 16], strides = [1, 1]} : vector<16x96xf32> to vector<16x16xf32>
    %48 = vector.extract_strided_slice %32 {offsets = [0, 48], sizes = [16, 16], strides = [1, 1]} : vector<16x96xf32> to vector<16x16xf32>
    %49 = vector.extract_strided_slice %32 {offsets = [0, 80], sizes = [16, 16], strides = [1, 1]} : vector<16x96xf32> to vector<16x16xf32>
    %cst_20 = arith.constant dense<0.000000e+00> : vector<16x16xf32>
    %50 = tpu.matmul %47, %48, %cst_20 {dimension_numbers = #tpu.dot_dimension_numbers<[1], [1], [0], [0], [0, 0, 1, 0], [], []>} : vector<16x16xf32>, vector<16x16xf32>, vector<16x16xf32> -> vector<16x16xf32>
    %cst_21 = arith.constant 8.000000e+01 : f32
    %51 = vector.broadcast %cst_21 : f32 to vector<16x16xf32>
    %52 = arith.minimumf %50, %51 : vector<16x16xf32>
    %53 = math.exp %52 : vector<16x16xf32>
    %54 = arith.mulf %53, %5 : vector<16x16xf32>
    %cst_22 = arith.constant dense<0.000000e+00> : vector<16xf32>
    %55 = vector.multi_reduction <add>, %54, %cst_22 [1] : vector<16x16xf32> to vector<16xf32>
    %56 = vector.shape_cast %55 : vector<16xf32> to vector<16x1xf32>
    %57 = tpu.reciprocal %56 {approx = true} : vector<16x1xf32> -> vector<16x1xf32>
    %58 = vector.broadcast %57 : vector<16x1xf32> to vector<16x16xf32>
    %59 = arith.mulf %54, %58 : vector<16x16xf32>
    %cst_23 = arith.constant dense<0.000000e+00> : vector<16x16xf32>
    %60 = tpu.matmul %59, %49, %cst_23 {dimension_numbers = #tpu.dot_dimension_numbers<[1], [0], [0], [1], [0, 0, 1, 1], [], []>} : vector<16x16xf32>, vector<16x16xf32>, vector<16x16xf32> -> vector<16x16xf32>
    %61 = tpu.concatenate %46, %60 in 1 : vector<16x16xf32>, vector<16x16xf32> -> vector<16x32xf32>
    %c32 = arith.constant 32 : index
    %c0_24 = arith.constant 0 : index
    %62 = vector.load %arg2[%c32, %c0_24] : memref<544x128xf32, #tpu.memory_space<vmem>>, vector<32x32xf32>
    %cst_25 = arith.constant dense<0.000000e+00> : vector<16x32xf32>
    %63 = tpu.matmul %61, %62, %cst_25 {dimension_numbers = #tpu.dot_dimension_numbers<[1], [0], [0], [1], [0, 0, 1, 1], [], []>} : vector<16x32xf32>, vector<32x32xf32>, vector<16x32xf32> -> vector<16x32xf32>
    %c523 = arith.constant 523 : index
    %c0_26 = arith.constant 0 : index
    %64 = vector.load %arg2[%c523, %c0_26] : memref<544x128xf32, #tpu.memory_space<vmem>>, vector<1x32xf32>
    %65 = vector.broadcast %64 : vector<1x32xf32> to vector<16x32xf32>
    %66 = arith.addf %63, %65 : vector<16x32xf32>
    %67 = arith.addf %4, %66 : vector<16x32xf32>
    %c524 = arith.constant 524 : index
    %c0_27 = arith.constant 0 : index
    %68 = vector.load %arg2[%c524, %c0_27] : memref<544x128xf32, #tpu.memory_space<vmem>>, vector<1x32xf32>
    %c525 = arith.constant 525 : index
    %c0_28 = arith.constant 0 : index
    %69 = vector.load %arg2[%c525, %c0_28] : memref<544x128xf32, #tpu.memory_space<vmem>>, vector<1x32xf32>
    %cst_29 = arith.constant dense<0.000000e+00> : vector<16xf32>
    %70 = vector.multi_reduction <add>, %67, %cst_29 [1] : vector<16x32xf32> to vector<16xf32>
    %71 = vector.shape_cast %70 : vector<16xf32> to vector<16x1xf32>
    %cst_30 = arith.constant 3.200000e+01 : f32
    %72 = vector.broadcast %cst_30 : f32 to vector<16x1xf32>
    %73 = arith.divf %71, %72 : vector<16x1xf32>
    %74 = vector.broadcast %73 : vector<16x1xf32> to vector<16x32xf32>
    %75 = arith.subf %67, %74 : vector<16x32xf32>
    %76 = arith.mulf %75, %75 : vector<16x32xf32>
    %cst_31 = arith.constant dense<0.000000e+00> : vector<16xf32>
    %77 = vector.multi_reduction <add>, %76, %cst_31 [1] : vector<16x32xf32> to vector<16xf32>
    %78 = vector.shape_cast %77 : vector<16xf32> to vector<16x1xf32>
    %cst_32 = arith.constant 3.200000e+01 : f32
    %79 = vector.broadcast %cst_32 : f32 to vector<16x1xf32>
    %80 = arith.divf %78, %79 : vector<16x1xf32>
    %cst_33 = arith.constant 9.99999997E-7 : f32
    %81 = vector.broadcast %cst_33 : f32 to vector<16x1xf32>
    %82 = arith.addf %80, %81 : vector<16x1xf32>
    %83 = math.rsqrt %82 : vector<16x1xf32>
    %84 = vector.broadcast %83 : vector<16x1xf32> to vector<16x32xf32>
    %85 = arith.mulf %75, %84 : vector<16x32xf32>
    %86 = vector.broadcast %68 : vector<1x32xf32> to vector<16x32xf32>
    %87 = arith.mulf %85, %86 : vector<16x32xf32>
    %88 = vector.broadcast %69 : vector<1x32xf32> to vector<16x32xf32>
    %89 = arith.addf %87, %88 : vector<16x32xf32>
    %c64 = arith.constant 64 : index
    %c0_34 = arith.constant 0 : index
    %90 = vector.load %arg2[%c64, %c0_34] : memref<544x128xf32, #tpu.memory_space<vmem>>, vector<32x128xf32>
    %cst_35 = arith.constant dense<0.000000e+00> : vector<16x128xf32>
    %91 = tpu.matmul %89, %90, %cst_35 {dimension_numbers = #tpu.dot_dimension_numbers<[1], [0], [0], [1], [0, 0, 1, 1], [], []>} : vector<16x32xf32>, vector<32x128xf32>, vector<16x128xf32> -> vector<16x128xf32>
    %c526 = arith.constant 526 : index
    %c0_36 = arith.constant 0 : index
    %92 = vector.load %arg2[%c526, %c0_36] : memref<544x128xf32, #tpu.memory_space<vmem>>, vector<1x128xf32>
    %93 = vector.broadcast %92 : vector<1x128xf32> to vector<16x128xf32>
    %94 = arith.addf %91, %93 : vector<16x128xf32>
    %cst_37 = arith.constant 5.000000e-01 : f32
    %95 = vector.broadcast %cst_37 : f32 to vector<16x128xf32>
    %96 = arith.mulf %95, %94 : vector<16x128xf32>
    %cst_38 = arith.constant 4.471500e-02 : f32
    %97 = vector.broadcast %cst_38 : f32 to vector<16x128xf32>
    %98 = arith.mulf %97, %94 : vector<16x128xf32>
    %99 = arith.mulf %98, %94 : vector<16x128xf32>
    %100 = arith.mulf %99, %94 : vector<16x128xf32>
    %101 = arith.addf %94, %100 : vector<16x128xf32>
    %cst_39 = arith.constant 0.797884583 : f32
    %102 = vector.broadcast %cst_39 : f32 to vector<16x128xf32>
    %103 = arith.mulf %102, %101 : vector<16x128xf32>
    %104 = math.tanh %103 : vector<16x128xf32>
    %cst_40 = arith.constant 1.000000e+00 : f32
    %105 = vector.broadcast %cst_40 : f32 to vector<16x128xf32>
    %106 = arith.addf %105, %104 : vector<16x128xf32>
    %107 = arith.mulf %96, %106 : vector<16x128xf32>
    %c96 = arith.constant 96 : index
    %c0_41 = arith.constant 0 : index
    %108 = vector.load %arg2[%c96, %c0_41] : memref<544x128xf32, #tpu.memory_space<vmem>>, vector<128x32xf32>
    %cst_42 = arith.constant dense<0.000000e+00> : vector<16x32xf32>
    %109 = tpu.matmul %107, %108, %cst_42 {dimension_numbers = #tpu.dot_dimension_numbers<[1], [0], [0], [1], [0, 0, 1, 1], [], []>} : vector<16x128xf32>, vector<128x32xf32>, vector<16x32xf32> -> vector<16x32xf32>
    %c527 = arith.constant 527 : index
    %c0_43 = arith.constant 0 : index
    %110 = vector.load %arg2[%c527, %c0_43] : memref<544x128xf32, #tpu.memory_space<vmem>>, vector<1x32xf32>
    %111 = vector.broadcast %110 : vector<1x32xf32> to vector<16x32xf32>
    %112 = arith.addf %109, %111 : vector<16x32xf32>
    %113 = arith.addf %67, %112 : vector<16x32xf32>
    %c528 = arith.constant 528 : index
    %c0_44 = arith.constant 0 : index
    %114 = vector.load %arg2[%c528, %c0_44] : memref<544x128xf32, #tpu.memory_space<vmem>>, vector<1x32xf32>
    %c529 = arith.constant 529 : index
    %c0_45 = arith.constant 0 : index
    %115 = vector.load %arg2[%c529, %c0_45] : memref<544x128xf32, #tpu.memory_space<vmem>>, vector<1x32xf32>
    %cst_46 = arith.constant dense<0.000000e+00> : vector<16xf32>
    %116 = vector.multi_reduction <add>, %113, %cst_46 [1] : vector<16x32xf32> to vector<16xf32>
    %117 = vector.shape_cast %116 : vector<16xf32> to vector<16x1xf32>
    %cst_47 = arith.constant 3.200000e+01 : f32
    %118 = vector.broadcast %cst_47 : f32 to vector<16x1xf32>
    %119 = arith.divf %117, %118 : vector<16x1xf32>
    %120 = vector.broadcast %119 : vector<16x1xf32> to vector<16x32xf32>
    %121 = arith.subf %113, %120 : vector<16x32xf32>
    %122 = arith.mulf %121, %121 : vector<16x32xf32>
    %cst_48 = arith.constant dense<0.000000e+00> : vector<16xf32>
    %123 = vector.multi_reduction <add>, %122, %cst_48 [1] : vector<16x32xf32> to vector<16xf32>
    %124 = vector.shape_cast %123 : vector<16xf32> to vector<16x1xf32>
    %cst_49 = arith.constant 3.200000e+01 : f32
    %125 = vector.broadcast %cst_49 : f32 to vector<16x1xf32>
    %126 = arith.divf %124, %125 : vector<16x1xf32>
    %cst_50 = arith.constant 9.99999997E-7 : f32
    %127 = vector.broadcast %cst_50 : f32 to vector<16x1xf32>
    %128 = arith.addf %126, %127 : vector<16x1xf32>
    %129 = math.rsqrt %128 : vector<16x1xf32>
    %130 = vector.broadcast %129 : vector<16x1xf32> to vector<16x32xf32>
    %131 = arith.mulf %121, %130 : vector<16x32xf32>
    %132 = vector.broadcast %114 : vector<1x32xf32> to vector<16x32xf32>
    %133 = arith.mulf %131, %132 : vector<16x32xf32>
    %134 = vector.broadcast %115 : vector<1x32xf32> to vector<16x32xf32>
    %135 = arith.addf %133, %134 : vector<16x32xf32>
    %c224 = arith.constant 224 : index
    %c0_51 = arith.constant 0 : index
    %136 = vector.load %arg2[%c224, %c0_51] : memref<544x128xf32, #tpu.memory_space<vmem>>, vector<32x96xf32>
    %cst_52 = arith.constant dense<0.000000e+00> : vector<16x96xf32>
    %137 = tpu.matmul %135, %136, %cst_52 {dimension_numbers = #tpu.dot_dimension_numbers<[1], [0], [0], [1], [0, 0, 1, 1], [], []>} : vector<16x32xf32>, vector<32x96xf32>, vector<16x96xf32> -> vector<16x96xf32>
    %c530 = arith.constant 530 : index
    %c0_53 = arith.constant 0 : index
    %138 = vector.load %arg2[%c530, %c0_53] : memref<544x128xf32, #tpu.memory_space<vmem>>, vector<1x96xf32>
    %139 = vector.broadcast %138 : vector<1x96xf32> to vector<16x96xf32>
    %140 = arith.addf %137, %139 : vector<16x96xf32>
    %141 = vector.extract_strided_slice %140 {offsets = [0, 0], sizes = [16, 16], strides = [1, 1]} : vector<16x96xf32> to vector<16x16xf32>
    %142 = vector.extract_strided_slice %140 {offsets = [0, 32], sizes = [16, 16], strides = [1, 1]} : vector<16x96xf32> to vector<16x16xf32>
    %143 = vector.extract_strided_slice %140 {offsets = [0, 64], sizes = [16, 16], strides = [1, 1]} : vector<16x96xf32> to vector<16x16xf32>
    %cst_54 = arith.constant dense<0.000000e+00> : vector<16x16xf32>
    %144 = tpu.matmul %141, %142, %cst_54 {dimension_numbers = #tpu.dot_dimension_numbers<[1], [1], [0], [0], [0, 0, 1, 0], [], []>} : vector<16x16xf32>, vector<16x16xf32>, vector<16x16xf32> -> vector<16x16xf32>
    %cst_55 = arith.constant 8.000000e+01 : f32
    %145 = vector.broadcast %cst_55 : f32 to vector<16x16xf32>
    %146 = arith.minimumf %144, %145 : vector<16x16xf32>
    %147 = math.exp %146 : vector<16x16xf32>
    %148 = arith.mulf %147, %5 : vector<16x16xf32>
    %cst_56 = arith.constant dense<0.000000e+00> : vector<16xf32>
    %149 = vector.multi_reduction <add>, %148, %cst_56 [1] : vector<16x16xf32> to vector<16xf32>
    %150 = vector.shape_cast %149 : vector<16xf32> to vector<16x1xf32>
    %151 = tpu.reciprocal %150 {approx = true} : vector<16x1xf32> -> vector<16x1xf32>
    %152 = vector.broadcast %151 : vector<16x1xf32> to vector<16x16xf32>
    %153 = arith.mulf %148, %152 : vector<16x16xf32>
    %cst_57 = arith.constant dense<0.000000e+00> : vector<16x16xf32>
    %154 = tpu.matmul %153, %143, %cst_57 {dimension_numbers = #tpu.dot_dimension_numbers<[1], [0], [0], [1], [0, 0, 1, 1], [], []>} : vector<16x16xf32>, vector<16x16xf32>, vector<16x16xf32> -> vector<16x16xf32>
    %155 = vector.extract_strided_slice %140 {offsets = [0, 16], sizes = [16, 16], strides = [1, 1]} : vector<16x96xf32> to vector<16x16xf32>
    %156 = vector.extract_strided_slice %140 {offsets = [0, 48], sizes = [16, 16], strides = [1, 1]} : vector<16x96xf32> to vector<16x16xf32>
    %157 = vector.extract_strided_slice %140 {offsets = [0, 80], sizes = [16, 16], strides = [1, 1]} : vector<16x96xf32> to vector<16x16xf32>
    %cst_58 = arith.constant dense<0.000000e+00> : vector<16x16xf32>
    %158 = tpu.matmul %155, %156, %cst_58 {dimension_numbers = #tpu.dot_dimension_numbers<[1], [1], [0], [0], [0, 0, 1, 0], [], []>} : vector<16x16xf32>, vector<16x16xf32>, vector<16x16xf32> -> vector<16x16xf32>
    %cst_59 = arith.constant 8.000000e+01 : f32
    %159 = vector.broadcast %cst_59 : f32 to vector<16x16xf32>
    %160 = arith.minimumf %158, %159 : vector<16x16xf32>
    %161 = math.exp %160 : vector<16x16xf32>
    %162 = arith.mulf %161, %5 : vector<16x16xf32>
    %cst_60 = arith.constant dense<0.000000e+00> : vector<16xf32>
    %163 = vector.multi_reduction <add>, %162, %cst_60 [1] : vector<16x16xf32> to vector<16xf32>
    %164 = vector.shape_cast %163 : vector<16xf32> to vector<16x1xf32>
    %165 = tpu.reciprocal %164 {approx = true} : vector<16x1xf32> -> vector<16x1xf32>
    %166 = vector.broadcast %165 : vector<16x1xf32> to vector<16x16xf32>
    %167 = arith.mulf %162, %166 : vector<16x16xf32>
    %cst_61 = arith.constant dense<0.000000e+00> : vector<16x16xf32>
    %168 = tpu.matmul %167, %157, %cst_61 {dimension_numbers = #tpu.dot_dimension_numbers<[1], [0], [0], [1], [0, 0, 1, 1], [], []>} : vector<16x16xf32>, vector<16x16xf32>, vector<16x16xf32> -> vector<16x16xf32>
    %169 = tpu.concatenate %154, %168 in 1 : vector<16x16xf32>, vector<16x16xf32> -> vector<16x32xf32>
    %c256 = arith.constant 256 : index
    %c0_62 = arith.constant 0 : index
    %170 = vector.load %arg2[%c256, %c0_62] : memref<544x128xf32, #tpu.memory_space<vmem>>, vector<32x32xf32>
    %cst_63 = arith.constant dense<0.000000e+00> : vector<16x32xf32>
    %171 = tpu.matmul %169, %170, %cst_63 {dimension_numbers = #tpu.dot_dimension_numbers<[1], [0], [0], [1], [0, 0, 1, 1], [], []>} : vector<16x32xf32>, vector<32x32xf32>, vector<16x32xf32> -> vector<16x32xf32>
    %c531 = arith.constant 531 : index
    %c0_64 = arith.constant 0 : index
    %172 = vector.load %arg2[%c531, %c0_64] : memref<544x128xf32, #tpu.memory_space<vmem>>, vector<1x32xf32>
    %173 = vector.broadcast %172 : vector<1x32xf32> to vector<16x32xf32>
    %174 = arith.addf %171, %173 : vector<16x32xf32>
    %175 = arith.addf %113, %174 : vector<16x32xf32>
    %c532 = arith.constant 532 : index
    %c0_65 = arith.constant 0 : index
    %176 = vector.load %arg2[%c532, %c0_65] : memref<544x128xf32, #tpu.memory_space<vmem>>, vector<1x32xf32>
    %c533 = arith.constant 533 : index
    %c0_66 = arith.constant 0 : index
    %177 = vector.load %arg2[%c533, %c0_66] : memref<544x128xf32, #tpu.memory_space<vmem>>, vector<1x32xf32>
    %cst_67 = arith.constant dense<0.000000e+00> : vector<16xf32>
    %178 = vector.multi_reduction <add>, %175, %cst_67 [1] : vector<16x32xf32> to vector<16xf32>
    %179 = vector.shape_cast %178 : vector<16xf32> to vector<16x1xf32>
    %cst_68 = arith.constant 3.200000e+01 : f32
    %180 = vector.broadcast %cst_68 : f32 to vector<16x1xf32>
    %181 = arith.divf %179, %180 : vector<16x1xf32>
    %182 = vector.broadcast %181 : vector<16x1xf32> to vector<16x32xf32>
    %183 = arith.subf %175, %182 : vector<16x32xf32>
    %184 = arith.mulf %183, %183 : vector<16x32xf32>
    %cst_69 = arith.constant dense<0.000000e+00> : vector<16xf32>
    %185 = vector.multi_reduction <add>, %184, %cst_69 [1] : vector<16x32xf32> to vector<16xf32>
    %186 = vector.shape_cast %185 : vector<16xf32> to vector<16x1xf32>
    %cst_70 = arith.constant 3.200000e+01 : f32
    %187 = vector.broadcast %cst_70 : f32 to vector<16x1xf32>
    %188 = arith.divf %186, %187 : vector<16x1xf32>
    %cst_71 = arith.constant 9.99999997E-7 : f32
    %189 = vector.broadcast %cst_71 : f32 to vector<16x1xf32>
    %190 = arith.addf %188, %189 : vector<16x1xf32>
    %191 = math.rsqrt %190 : vector<16x1xf32>
    %192 = vector.broadcast %191 : vector<16x1xf32> to vector<16x32xf32>
    %193 = arith.mulf %183, %192 : vector<16x32xf32>
    %194 = vector.broadcast %176 : vector<1x32xf32> to vector<16x32xf32>
    %195 = arith.mulf %193, %194 : vector<16x32xf32>
    %196 = vector.broadcast %177 : vector<1x32xf32> to vector<16x32xf32>
    %197 = arith.addf %195, %196 : vector<16x32xf32>
    %c288 = arith.constant 288 : index
    %c0_72 = arith.constant 0 : index
    %198 = vector.load %arg2[%c288, %c0_72] : memref<544x128xf32, #tpu.memory_space<vmem>>, vector<32x128xf32>
    %cst_73 = arith.constant dense<0.000000e+00> : vector<16x128xf32>
    %199 = tpu.matmul %197, %198, %cst_73 {dimension_numbers = #tpu.dot_dimension_numbers<[1], [0], [0], [1], [0, 0, 1, 1], [], []>} : vector<16x32xf32>, vector<32x128xf32>, vector<16x128xf32> -> vector<16x128xf32>
    %c534 = arith.constant 534 : index
    %c0_74 = arith.constant 0 : index
    %200 = vector.load %arg2[%c534, %c0_74] : memref<544x128xf32, #tpu.memory_space<vmem>>, vector<1x128xf32>
    %201 = vector.broadcast %200 : vector<1x128xf32> to vector<16x128xf32>
    %202 = arith.addf %199, %201 : vector<16x128xf32>
    %cst_75 = arith.constant 5.000000e-01 : f32
    %203 = vector.broadcast %cst_75 : f32 to vector<16x128xf32>
    %204 = arith.mulf %203, %202 : vector<16x128xf32>
    %cst_76 = arith.constant 4.471500e-02 : f32
    %205 = vector.broadcast %cst_76 : f32 to vector<16x128xf32>
    %206 = arith.mulf %205, %202 : vector<16x128xf32>
    %207 = arith.mulf %206, %202 : vector<16x128xf32>
    %208 = arith.mulf %207, %202 : vector<16x128xf32>
    %209 = arith.addf %202, %208 : vector<16x128xf32>
    %cst_77 = arith.constant 0.797884583 : f32
    %210 = vector.broadcast %cst_77 : f32 to vector<16x128xf32>
    %211 = arith.mulf %210, %209 : vector<16x128xf32>
    %212 = math.tanh %211 : vector<16x128xf32>
    %cst_78 = arith.constant 1.000000e+00 : f32
    %213 = vector.broadcast %cst_78 : f32 to vector<16x128xf32>
    %214 = arith.addf %213, %212 : vector<16x128xf32>
    %215 = arith.mulf %204, %214 : vector<16x128xf32>
    %c320 = arith.constant 320 : index
    %c0_79 = arith.constant 0 : index
    %216 = vector.load %arg2[%c320, %c0_79] : memref<544x128xf32, #tpu.memory_space<vmem>>, vector<128x32xf32>
    %cst_80 = arith.constant dense<0.000000e+00> : vector<16x32xf32>
    %217 = tpu.matmul %215, %216, %cst_80 {dimension_numbers = #tpu.dot_dimension_numbers<[1], [0], [0], [1], [0, 0, 1, 1], [], []>} : vector<16x128xf32>, vector<128x32xf32>, vector<16x32xf32> -> vector<16x32xf32>
    %c535 = arith.constant 535 : index
    %c0_81 = arith.constant 0 : index
    %218 = vector.load %arg2[%c535, %c0_81] : memref<544x128xf32, #tpu.memory_space<vmem>>, vector<1x32xf32>
    %219 = vector.broadcast %218 : vector<1x32xf32> to vector<16x32xf32>
    %220 = arith.addf %217, %219 : vector<16x32xf32>
    %221 = arith.addf %175, %220 : vector<16x32xf32>
    %c536 = arith.constant 536 : index
    %c0_82 = arith.constant 0 : index
    %222 = vector.load %arg2[%c536, %c0_82] : memref<544x128xf32, #tpu.memory_space<vmem>>, vector<1x32xf32>
    %c537 = arith.constant 537 : index
    %c0_83 = arith.constant 0 : index
    %223 = vector.load %arg2[%c537, %c0_83] : memref<544x128xf32, #tpu.memory_space<vmem>>, vector<1x32xf32>
    %cst_84 = arith.constant dense<0.000000e+00> : vector<16xf32>
    %224 = vector.multi_reduction <add>, %221, %cst_84 [1] : vector<16x32xf32> to vector<16xf32>
    %225 = vector.shape_cast %224 : vector<16xf32> to vector<16x1xf32>
    %cst_85 = arith.constant 3.200000e+01 : f32
    %226 = vector.broadcast %cst_85 : f32 to vector<16x1xf32>
    %227 = arith.divf %225, %226 : vector<16x1xf32>
    %228 = vector.broadcast %227 : vector<16x1xf32> to vector<16x32xf32>
    %229 = arith.subf %221, %228 : vector<16x32xf32>
    %230 = arith.mulf %229, %229 : vector<16x32xf32>
    %cst_86 = arith.constant dense<0.000000e+00> : vector<16xf32>
    %231 = vector.multi_reduction <add>, %230, %cst_86 [1] : vector<16x32xf32> to vector<16xf32>
    %232 = vector.shape_cast %231 : vector<16xf32> to vector<16x1xf32>
    %cst_87 = arith.constant 3.200000e+01 : f32
    %233 = vector.broadcast %cst_87 : f32 to vector<16x1xf32>
    %234 = arith.divf %232, %233 : vector<16x1xf32>
    %cst_88 = arith.constant 9.99999997E-7 : f32
    %235 = vector.broadcast %cst_88 : f32 to vector<16x1xf32>
    %236 = arith.addf %234, %235 : vector<16x1xf32>
    %237 = math.rsqrt %236 : vector<16x1xf32>
    %238 = vector.broadcast %237 : vector<16x1xf32> to vector<16x32xf32>
    %239 = arith.mulf %229, %238 : vector<16x32xf32>
    %240 = vector.broadcast %222 : vector<1x32xf32> to vector<16x32xf32>
    %241 = arith.mulf %239, %240 : vector<16x32xf32>
    %242 = vector.broadcast %223 : vector<1x32xf32> to vector<16x32xf32>
    %243 = arith.addf %241, %242 : vector<16x32xf32>
    %c512 = arith.constant 512 : index
    %c0_89 = arith.constant 0 : index
    %244 = vector.load %arg2[%c512, %c0_89] : memref<544x128xf32, #tpu.memory_space<vmem>>, vector<8x16xf32>
    %cst_90 = arith.constant dense<0.000000e+00> : vector<8x32xf32>
    %245 = tpu.matmul %244, %243, %cst_90 {dimension_numbers = #tpu.dot_dimension_numbers<[1], [0], [0], [1], [0, 0, 1, 1], [], []>} : vector<8x16xf32>, vector<16x32xf32>, vector<8x32xf32> -> vector<8x32xf32>
    %c448 = arith.constant 448 : index
    %c0_91 = arith.constant 0 : index
    %246 = vector.load %arg2[%c448, %c0_91] : memref<544x128xf32, #tpu.memory_space<vmem>>, vector<32x128xf32>
    %cst_92 = arith.constant dense<0.000000e+00> : vector<8x128xf32>
    %247 = tpu.matmul %245, %246, %cst_92 {dimension_numbers = #tpu.dot_dimension_numbers<[1], [0], [0], [1], [0, 0, 1, 1], [], []>} : vector<8x32xf32>, vector<32x128xf32>, vector<8x128xf32> -> vector<8x128xf32>
    %c538 = arith.constant 538 : index
    %c0_93 = arith.constant 0 : index
    %248 = vector.load %arg2[%c538, %c0_93] : memref<544x128xf32, #tpu.memory_space<vmem>>, vector<1x128xf32>
    %249 = vector.broadcast %248 : vector<1x128xf32> to vector<8x128xf32>
    %250 = arith.addf %247, %249 : vector<8x128xf32>
    %c0_94 = arith.constant 0 : index
    %c0_95 = arith.constant 0 : index
    %251 = vector.load %arg3[%c0_94, %c0_95] : memref<8x128xf32, #tpu.memory_space<vmem>>, vector<8x128xf32>
    tpu.vector_store %arg3[%c0_94, %c0_95], %250 {strides = array<i32>} : memref<8x128xf32, #tpu.memory_space<vmem>>, vector<8x128xf32>,
    return
  }
}

</mosaic_0001>

<bundles_post_ra>
// kernel: modified_dino_forward.1
= control target key start
LH: loop header
LB: loop body
LE: loop exit
PB: predicated region body
PF: predicated region fallthrough
CT: control target
= control target key end

     0   :  { %vm355_vm0 = vcmask 261120   ;;  %vm491_vm1 = vcmask 130048   ;;  %s3152_s28 = smov 64   ;;  %s3153_s29 = smov 96   ;;  %vm3159_vm3 = vmmov 0   ;;  %s3926_s1 = inlined_call_operand.vmem [shape: f32[768,32], index: 1, kind: input, shape index: {}]   ;;  %s3927_s0 = inlined_call_operand.vmem [shape: f32[16,768], index: 0, kind: input, shape index: {}]   ;;  %s3928_s2 = inlined_call_operand.vmem [shape: f32[544,128], index: 2, kind: input, shape index: {}]   ;;  %s3929_s3 = inlined_call_operand.vmem [shape: f32[8,128], index: 3, kind: output, shape index: {}]  }
   0x1   :  { %v44_v0 = vld [vmem:[%s3926_s1 + $0x80] sm:$0xff]  ;;  %v45_v1 = vld [vmem:[%s3926_s1 + $0x88] sm:$0xff]  ;;  %v46_v11 = vld [vmem:[%s3926_s1 + $0x90] sm:$0xff]  ;;  %s3154_s30 = smov 80   ;;  %s3155_s4 = smov 112  }
   0x2   :  { %v76_v2 = vld [vmem:[%s3926_s1 + $0x180] sm:$0xff]  ;;  %v2786_v3 = vpack.c.bf16 %v45_v1, %v44_v0  ;;  %v77_v4 = vld [vmem:[%s3926_s1 + $0x188] sm:$0xff]  ;;  %v47_v13 = vld [vmem:[%s3926_s1 + $0x98] sm:$0xff]  ;;  %s3156_s9 = smov 48   ;;  %s3157_s16 = smov 16  }
   0x3   :  { %v28_v5 = vld [vmem:[%s3926_s1] sm:$0xff]  ;;  %v29_v6 = vld [vmem:[%s3926_s1 + $0x8] sm:$0xff]  ;;  %v2818_v7 = vpack.c.bf16 %v77_v4, %v76_v2  ;;  %v78_v14 = vld [vmem:[%s3926_s1 + $0x190] sm:$0xff]  ;;  %v2790_v16 = vpack.c.bf16 %v47_v13, %v46_v11 }
   0x4   :  { %v2788_v8 = vpack.c.bf16 %v29_v6, %v28_v5  ;;  %v60_v9 = vld [vmem:[%s3926_s1 + $0x100] sm:$0xff]  ;;  %v61_v10 = vld [vmem:[%s3926_s1 + $0x108] sm:$0xff]  ;;  %2787 = vmatprep.subr.bf16.mxu0 %v2786_v3  ;;  %v79_v15 = vld [vmem:[%s3926_s1 + $0x198] sm:$0xff] }
   0x5   :  { %v2820_v12 = vpack.c.bf16 %v61_v10, %v60_v9  ;;  %2819 = vmatprep.subr.bf16.mxu1 %v2818_v7  ;;  %v2822_v17 = vpack.c.bf16 %v79_v15, %v78_v14  ;;  %v30_v18 = vld [vmem:[%s3926_s1 + $0x10] sm:$0xff]  ;;  %v31_v19 = vld [vmem:[%s3926_s1 + $0x18] sm:$0xff]  ;;  %v48_v23 = vld [vmem:[%s3926_s1 + $0xa0] sm:$0xff] }
   0x6   :  { %2789 = vmatpush3.bf16.msra.mxu0 %v2788_v8  ;;  %v62_v20 = vld [vmem:[%s3926_s1 + $0x110] sm:$0xff]  ;;  %v2792_v21 = vpack.c.bf16 %v31_v19, %v30_v18  ;;  %v63_v22 = vld [vmem:[%s3926_s1 + $0x118] sm:$0xff]  ;;  %v49_v24 = vld [vmem:[%s3926_s1 + $0xa8] sm:$0xff] }
   0x7   :  { %2821 = vmatpush3.bf16.msra.mxu1 %v2820_v12  ;;  %2791 = vmatprep.subr.bf16.mxu0 %v2790_v16  ;;  %v2824_v25 = vpack.c.bf16 %v63_v22, %v62_v20  ;;  %v2794_v26 = vpack.c.bf16 %v49_v24, %v48_v23  ;;  %v80_v27 = vld [vmem:[%s3926_s1 + $0x1a0] sm:$0xff]  ;;  %v81_v28 = vld [vmem:[%s3926_s1 + $0x1a8] sm:$0xff]  ;;  %v50_v35 = vld [vmem:[%s3926_s1 + $0xb0] sm:$0xff] }
   0x8   :  { %2823 = vmatprep.subr.bf16.mxu1 %v2822_v17  ;;  %v32_v29 = vld [vmem:[%s3926_s1 + $0x20] sm:$0xff]  ;;  %v2826_v30 = vpack.c.bf16 %v81_v28, %v80_v27  ;;  %v33_v31 = vld [vmem:[%s3926_s1 + $0x28] sm:$0xff]  ;;  %v51_v36 = vld [vmem:[%s3926_s1 + $0xb8] sm:$0xff] }
   0x9   :  { %v64_v32 = vld [vmem:[%s3926_s1 + $0x120] sm:$0xff]  ;;  %v65_v33 = vld [vmem:[%s3926_s1 + $0x128] sm:$0xff]  ;;  %v2796_v34 = vpack.c.bf16 %v33_v31, %v32_v29  ;;  %v82_v37 = vld [vmem:[%s3926_s1 + $0x1b0] sm:$0xff]  ;;  %v2798_v39 = vpack.c.bf16 %v51_v36, %v50_v35 }
   0xa   :  { %2793 = vmatpush3.bf16.msra.mxu0 %v2792_v21  ;;  %v2828_v38 = vpack.c.bf16 %v65_v33, %v64_v32  ;;  %v83_v40 = vld [vmem:[%s3926_s1 + $0x1b8] sm:$0xff]  ;;  %v34_v41 = vld [vmem:[%s3926_s1 + $0x30] sm:$0xff]  ;;  %v52_v46 = vld [vmem:[%s3926_s1 + $0xc0] sm:$0xff] }
   0xb   :  { %2825 = vmatpush3.bf16.msra.mxu1 %v2824_v25  ;;  %2795 = vmatprep.subr.bf16.mxu0 %v2794_v26  ;;  %v35_v42 = vld [vmem:[%s3926_s1 + $0x38] sm:$0xff]  ;;  %v2830_v43 = vpack.c.bf16 %v83_v40, %v82_v37  ;;  %v66_v44 = vld [vmem:[%s3926_s1 + $0x130] sm:$0xff]  ;;  %v53_v47 = vld [vmem:[%s3926_s1 + $0xc8] sm:$0xff] }
   0xc   :  { %2827 = vmatprep.subr.bf16.mxu1 %v2826_v30  ;;  %v67_v45 = vld [vmem:[%s3926_s1 + $0x138] sm:$0xff]  ;;  %v84_v48 = vld [vmem:[%s3926_s1 + $0x1c0] sm:$0xff]  ;;  %v85_v49 = vld [vmem:[%s3926_s1 + $0x1c8] sm:$0xff]  ;;  %v2800_v50 = vpack.c.bf16 %v35_v42, %v34_v41  ;;  %v2802_v52 = vpack.c.bf16 %v53_v47, %v52_v46 }
   0xd   :  { %v2832_v51 = vpack.c.bf16 %v67_v45, %v66_v44  ;;  %v36_v53 = vld [vmem:[%s3926_s1 + $0x40] sm:$0xff]  ;;  %v37_v54 = vld [vmem:[%s3926_s1 + $0x48] sm:$0xff]  ;;  %v2834_v56 = vpack.c.bf16 %v85_v49, %v84_v48  ;;  %v54_v58 = vld [vmem:[%s3926_s1 + $0xd0] sm:$0xff] }
   0xe   :  { %2797 = vmatpush3.bf16.msra.mxu0 %v2796_v34  ;;  %v68_v55 = vld [vmem:[%s3926_s1 + $0x140] sm:$0xff]  ;;  %v69_v57 = vld [vmem:[%s3926_s1 + $0x148] sm:$0xff]  ;;  %v55_v59 = vld [vmem:[%s3926_s1 + $0xd8] sm:$0xff]  ;;  %v2804_v62 = vpack.c.bf16 %v37_v54, %v36_v53 }
   0xf   :  { %2829 = vmatpush3.bf16.msra.mxu1 %v2828_v38  ;;  %2799 = vmatprep.subr.bf16.mxu0 %v2798_v39  ;;  %v86_v60 = vld [vmem:[%s3926_s1 + $0x1d0] sm:$0xff]  ;;  %v87_v61 = vld [vmem:[%s3926_s1 + $0x1d8] sm:$0xff]  ;;  %v2836_v63 = vpack.c.bf16 %v69_v57, %v68_v55  ;;  %v2806_v0 = vpack.c.bf16 %v55_v59, %v54_v58  ;;  %v56_v6 = vld [vmem:[%s3926_s1 + $0xe0] sm:$0xff] }
  0x10   :  { %2831 = vmatprep.subr.bf16.mxu1 %v2830_v43  ;;  %v38_v1 = vld [vmem:[%s3926_s1 + $0x50] sm:$0xff]  ;;  %v39_v2 = vld [vmem:[%s3926_s1 + $0x58] sm:$0xff]  ;;  %v2838_v4 = vpack.c.bf16 %v87_v61, %v86_v60  ;;  %v57_v7 = vld [vmem:[%s3926_s1 + $0xe8] sm:$0xff] }
  0x11   :  { %v70_v3 = vld [vmem:[%s3926_s1 + $0x150] sm:$0xff]  ;;  %v71_v5 = vld [vmem:[%s3926_s1 + $0x158] sm:$0xff]  ;;  %v88_v8 = vld [vmem:[%s3926_s1 + $0x1e0] sm:$0xff]  ;;  %v2808_v10 = vpack.c.bf16 %v39_v2, %v38_v1  ;;  %v2810_v14 = vpack.c.bf16 %v57_v7, %v56_v6 }
  0x12   :  { %2801 = vmatpush3.bf16.msra.mxu0 %v2800_v50  ;;  %v89_v9 = vld [vmem:[%s3926_s1 + $0x1e8] sm:$0xff]  ;;  %v40_v11 = vld [vmem:[%s3926_s1 + $0x60] sm:$0xff]  ;;  %v2840_v13 = vpack.c.bf16 %v71_v5, %v70_v3  ;;  %v19_v17 = vld [vmem:[%s3927_s0 + $0x18] sm:$0xff] }
  0x13   :  { %2833 = vmatpush3.bf16.msra.mxu1 %v2832_v51  ;;  %2803 = vmatprep.subr.bf16.mxu0 %v2802_v52  ;;  %v41_v12 = vld [vmem:[%s3926_s1 + $0x68] sm:$0xff]  ;;  %v72_v15 = vld [vmem:[%s3926_s1 + $0x160] sm:$0xff]  ;;  %v2842_v18 = vpack.c.bf16 %v89_v9, %v88_v8  ;;  %v58_v20 = vld [vmem:[%s3926_s1 + $0xf0] sm:$0xff] }
  0x14   :  { %2835 = vmatprep.subr.bf16.mxu1 %v2834_v56  ;;  %v17_v16 = vld [vmem:[%s3927_s0 + $0x8] sm:$0xff]  ;;  %v59_v21 = vld [vmem:[%s3926_s1 + $0xf8] sm:$0xff]  ;;  %v90_v22 = vld [vmem:[%s3926_s1 + $0x1f0] sm:$0xff]  ;;  %263 = vmatprep.mubr.f32.mxu1 %v19_v17  ;;  %v2812_v24 = vpack.c.bf16 %v41_v12, %v40_v11 }
  0x15   :  { %v73_v19 = vld [vmem:[%s3926_s1 + $0x168] sm:$0xff]  ;;  %188 = vmatprep.mubr.f32.mxu0 %v17_v16  ;;  %v91_v23 = vld [vmem:[%s3926_s1 + $0x1f8] sm:$0xff]  ;;  %v2814_v26 = vpack.c.bf16 %v59_v21, %v58_v20  ;;  %v42_v27 = vld [vmem:[%s3926_s1 + $0x70] sm:$0xff] }
  0x16   :  { %2805 = vmatpush3.bf16.msra.mxu0 %v2804_v62  ;;  %v2844_v25 = vpack.c.bf16 %v73_v19, %v72_v15  ;;  %v43_v28 = vld [vmem:[%s3926_s1 + $0x78] sm:$0xff]  ;;  %v74_v29 = vld [vmem:[%s3926_s1 + $0x170] sm:$0xff]  ;;  %v2846_v30 = vpack.c.bf16 %v91_v23, %v90_v22  ;;  %v108_v32 = vld [vmem:[%s3926_s1 + $0x280] sm:$0xff] }
  0x17   :  { %2837 = vmatpush3.bf16.msra.mxu1 %v2836_v63  ;;  %2807 = vmatprep.subr.bf16.mxu0 %v2806_v0  ;;  %v75_v31 = vld [vmem:[%s3926_s1 + $0x178] sm:$0xff]  ;;  %v109_v33 = vld [vmem:[%s3926_s1 + $0x288] sm:$0xff]  ;;  %v2816_v34 = vpack.c.bf16 %v43_v28, %v42_v27  ;;  %v92_v37 = vld [vmem:[%s3926_s1 + $0x200] sm:$0xff] }
  0x18   :  { %2839 = vmatprep.subr.bf16.mxu1 %v2838_v4  ;;  %v2848_v35 = vpack.c.bf16 %v75_v31, %v74_v29  ;;  %v2850_v36 = vpack.c.bf16 %v109_v33, %v108_v32  ;;  %v93_v38 = vld [vmem:[%s3926_s1 + $0x208] sm:$0xff]  ;;  %v110_v39 = vld [vmem:[%s3926_s1 + $0x290] sm:$0xff]  ;;  %v111_v40 = vld [vmem:[%s3926_s1 + $0x298] sm:$0xff] }
  0x19   :  { %v16_v41 = vld [vmem:[%s3927_s0] sm:$0xff]  ;;  %v2852_v42 = vpack.c.bf16 %v93_v38, %v92_v37  ;;  %v18_v43 = vld [vmem:[%s3927_s0 + $0x10] sm:$0xff]  ;;  %v2854_v44 = vpack.c.bf16 %v111_v40, %v110_v39  ;;  %v95_v46 = vld [vmem:[%s3926_s1 + $0x218] sm:$0xff] }
  0x1a   :  { %2809 = vmatpush3.bf16.msra.mxu0 %v2808_v10  ;;  %v94_v45 = vld [vmem:[%s3926_s1 + $0x210] sm:$0xff]  ;;  %v112_v47 = vld [vmem:[%s3926_s1 + $0x2a0] sm:$0xff]  ;;  %v113_v48 = vld [vmem:[%s3926_s1 + $0x2a8] sm:$0xff] }
  0x1b   :  { %2841 = vmatpush3.bf16.msra.mxu1 %v2840_v13  ;;  %2811 = vmatprep.subr.bf16.mxu0 %v2810_v14  ;;  %v23_v49 = vld [vmem:[%s3927_s0 + $0x38] sm:$0xff]  ;;  %v25_v50 = vld [vmem:[%s3927_s0 + $0x48] sm:$0xff]  ;;  %v2856_v51 = vpack.c.bf16 %v95_v46, %v94_v45  ;;  %v22_v52 = vld [vmem:[%s3927_s0 + $0x30] sm:$0xff]  ;;  %v2858_v53 = vpack.c.bf16 %v113_v48, %v112_v47 }
  0x1c   :  { %2843 = vmatprep.subr.bf16.mxu1 %v2842_v18  ;;  %v96_v54 = vld [vmem:[%s3926_s1 + $0x220] sm:$0xff]  ;;  %v97_v55 = vld [vmem:[%s3926_s1 + $0x228] sm:$0xff]  ;;  %v114_v57 = vld [vmem:[%s3926_s1 + $0x2b0] sm:$0xff] }
  0x1d   :  { %v24_v56 = vld [vmem:[%s3927_s0 + $0x40] sm:$0xff]  ;;  %v115_v58 = vld [vmem:[%s3926_s1 + $0x2b8] sm:$0xff]  ;;  %v21_v59 = vld [vmem:[%s3927_s0 + $0x28] sm:$0xff]  ;;  %v2860_v60 = vpack.c.bf16 %v97_v55, %v96_v54 }
  0x1e   :  { %2813 = vmatpush3.bf16.msra.mxu0 %v2812_v24  ;;  %v2862_v61 = vpack.c.bf16 %v115_v58, %v114_v57  ;;  %v98_v62 = vld [vmem:[%s3926_s1 + $0x230] sm:$0xff]  ;;  %v99_v63 = vld [vmem:[%s3926_s1 + $0x238] sm:$0xff]  ;;  %v116_v0 = vld [vmem:[%s3926_s1 + $0x2c0] sm:$0xff] }
  0x1f   :  { %2845 = vmatpush3.bf16.msra.mxu1 %v2844_v25  ;;  %2815 = vmatprep.subr.bf16.mxu0 %v2814_v26  ;;  %v117_v1 = vld [vmem:[%s3926_s1 + $0x2c8] sm:$0xff]  ;;  %v2864_v2 = vpack.c.bf16 %v99_v63, %v98_v62  ;;  %v100_v4 = vld [vmem:[%s3926_s1 + $0x240] sm:$0xff]  ;;  %v118_v6 = vld [vmem:[%s3926_s1 + $0x2d0] sm:$0xff] }
  0x20   :  { %2847 = vmatprep.subr.bf16.mxu1 %v2846_v30  ;;  %v2866_v3 = vpack.c.bf16 %v117_v1, %v116_v0  ;;  %v101_v5 = vld [vmem:[%s3926_s1 + $0x248] sm:$0xff]  ;;  %v119_v7 = vld [vmem:[%s3926_s1 + $0x2d8] sm:$0xff]  ;;  %v102_v10 = vld [vmem:[%s3926_s1 + $0x250] sm:$0xff] }
  0x21   :  { %v2868_v8 = vpack.c.bf16 %v101_v5, %v100_v4  ;;  %v2870_v9 = vpack.c.bf16 %v119_v7, %v118_v6  ;;  %v103_v11 = vld [vmem:[%s3926_s1 + $0x258] sm:$0xff]  ;;  %v120_v12 = vld [vmem:[%s3926_s1 + $0x2e0] sm:$0xff]  ;;  %v121_v13 = vld [vmem:[%s3926_s1 + $0x2e8] sm:$0xff] }
  0x22   :  { %2817 = vmatpush3.bf16.msra.mxu0 %v2816_v34  ;;  %v2872_v14 = vpack.c.bf16 %v103_v11, %v102_v10  ;;  %v2874_v15 = vpack.c.bf16 %v121_v13, %v120_v12  ;;  %v104_v16 = vld [vmem:[%s3926_s1 + $0x260] sm:$0xff]  ;;  %v105_v17 = vld [vmem:[%s3926_s1 + $0x268] sm:$0xff]  ;;  %v122_v18 = vld [vmem:[%s3926_s1 + $0x2f0] sm:$0xff] }
  0x23   :  { %2849 = vmatpush3.bf16.msra.mxu1 %v2848_v35  ;;  %2851 = vmatprep.subr.bf16.mxu0 %v2850_v36  ;;  %v123_v19 = vld [vmem:[%s3926_s1 + $0x2f8] sm:$0xff]  ;;  %v2876_v20 = vpack.c.bf16 %v105_v17, %v104_v16  ;;  %v106_v22 = vld [vmem:[%s3926_s1 + $0x270] sm:$0xff]  ;;  %v20_v25 = vld [vmem:[%s3927_s0 + $0x20] sm:$0xff] }
  0x24   :  { %v2878_v21 = vpack.c.bf16 %v123_v19, %v122_v18  ;;  %v107_v23 = vld [vmem:[%s3926_s1 + $0x278] sm:$0xff]  ;;  %v26_v27 = vld [vmem:[%s3927_s0 + $0x50] sm:$0xff]  ;;  %v14_v45 = vld [vmem:[%s3928_s2 + $0x1e0] sm:$0xff] }
  0x25   :  { %189 = vmatmul.mubr.f32.vlgmr.msra.gmra.mrb[0].mxu0 %v16_v41  ;;  %v2880_v24 = vpack.c.bf16 %v107_v23, %v106_v22  ;;  %v27_v26 = vld [vmem:[%s3927_s0 + $0x58] sm:$0xff]  ;;  %v397_v5 = vld [vmem:[%s3928_s2 + $0x10] sm:$0xff]  ;;  %v2294_v17 = vld [vmem:[%s3928_s2 + $0x209] ss:$0 sm:$0xff] }
  0x26   :  { %264 = vmatmul.mubr.f32.vlgmr.msra.gmra.mrb[0].mxu1 %v18_v43  ;;  %2853 = vmatpush3.bf16.msra.mxu0 %v2852_v42  ;;  %v398_v6 = vld [vmem:[%s3928_s2 + $0x18] sm:$0xff]  ;;  %vm3558_vm2 = vmpackc.low %vm491_vm1, %vm491_vm1 }
  0x27   :  { %2855 = vmatprep.subr.bf16.mxu0 %v2854_v44  ;;  %193 = vmatprep.mubr.f32.mxu0 %v23_v49  ;;  %v2886_v7 = vpack.c.bf16 %v398_v6, %v397_v5 }
  0x28   :  { %268 = vmatprep.mubr.f32.mxu1 %v25_v50 }
  0x29   :  { %194 = vmatmul.mubr.f32.gmra.mrb[2].mxu0 %v22_v52 }
  0x2a   :  { %2857 = vmatpush3.bf16.msra.mxu0 %v2856_v51  ;;  %269 = vmatmul.mubr.f32.gmra.mrb[2].mxu1 %v24_v56  ;;  %v15_v51 = vld [vmem:[%s3928_s2 + $0x1e8] sm:$0xff] }
  0x2b   :  { %2859 = vmatprep.subr.bf16.mxu0 %v2858_v53  ;;  %338 = vmatprep.mubr.f32.mxu0 %v21_v59 }
  0x2e   :  { %2861 = vmatpush3.bf16.msra.mxu0 %v2860_v60 }
  0x2f   :  { %2863 = vmatprep.subr.bf16.mxu0 %v2862_v61 }
  0x32   :  { %2865 = vmatpush3.bf16.msra.mxu0 %v2864_v2  ;;  %v395_v2 = vld [vmem:[%s3928_s2] sm:$0xff] }
  0x33   :  { %2867 = vmatprep.subr.bf16.mxu0 %v2866_v3  ;;  %v396_v3 = vld [vmem:[%s3928_s2 + $0x8] sm:$0xff] }
  0x34   :  { %v2882_v4 = vpack.c.bf16 %v396_v3, %v395_v2 }
  0x36   :  { %2869 = vmatpush3.bf16.msra.mxu0 %v2868_v8  ;;  %2883 = vmatprep.subr.bf16.mxu1 %v2882_v4 }
  0x37   :  { %2871 = vmatprep.subr.bf16.mxu0 %v2870_v9  ;;  %2885 = vmatpush3.bf16.msra.mxu1 %v2882_v4 }
  0x38   :  { %2887 = vmatprep.subr.bf16.mxu1 %v2886_v7 }
  0x3a   :  { %2873 = vmatpush3.bf16.msra.mxu0 %v2872_v14 }
  0x3b   :  { %2875 = vmatprep.subr.bf16.mxu0 %v2874_v15  ;;  %2889 = vmatpush3.bf16.msra.mxu1 %v2886_v7  ;;  %v2293_v15 = vld [vmem:[%s3928_s2 + $0x208] ss:$0 sm:$0xff] }
  0x3e   :  { %2877 = vmatpush3.bf16.msra.mxu0 %v2876_v20 }
  0x3f   :  { %2879 = vmatprep.subr.bf16.mxu0 %v2878_v21 }
  0x42   :  { %2881 = vmatpush3.bf16.msra.mxu0 %v2880_v24  ;;  %v2295_v24 = vld [vmem:[%s3928_s2 + $0x20a] ss:$0 sm:$0xff] }
  0x45   :  { %339 = vmatmul.mubr.f32.vlgmr.msra.gmra.mrb[4].mxu0 %v20_v25 }
  0x46   :  { %343 = vmatprep.mubr.f32.mxu0 %v27_v26 }
  0x49   :  { %344 = vmatmul.mubr.f32.gmra.mrb[6].mxu0 %v26_v27 }
  0xf8   :  { %v2382_v28 = vpop.f32.mrb[0].mxu0 }
  0xf9   :  { %v2420_v29 = vpop.f32.mrb[0].mxu1  ;;  %v2383_v30 = vpop.f32.mrb[1].mxu0 }
  0xfa   :  { %v2384_v31 = vadd.f32 %v2383_v30, %v2382_v28  ;;  %v2421_v32 = vpop.f32.mrb[1].mxu1 }
  0xfb   :  { %v2422_v33 = vadd.f32 %v2421_v32, %v2420_v29 }
  0xfc   :  { %v2385_v34 = vpop.f32.mrb[2].mxu0 }
  0xfd   :  { %v266_v35 = vadd.f32 %v2422_v33, %v2384_v31  ;;  %v2423_v36 = vpop.f32.mrb[2].mxu1  ;;  %v2386_v37 = vpop.f32.mrb[3].mxu0 }
  0xfe   :  { %v2387_v38 = vadd.f32 %v2386_v37, %v2385_v34  ;;  %v2424_v39 = vpop.f32.mrb[3].mxu1 }
  0xff   :  { %v2425_v40 = vadd.f32 %v2424_v39, %v2423_v36 }
 0x101   :  { %v271_v41 = vadd.f32 %v2425_v40, %v2387_v38 }
 0x118   :  { %v2458_v42 = vpop.f32.mrb[4].mxu0 }
 0x119   :  { %v2459_v43 = vpop.f32.mrb[5].mxu0 }
 0x11a   :  { %v2460_v44 = vadd.f32 %v2459_v43, %v2458_v42 }
 0x11c   :  { %v341_v46 = vadd.f32 %v2460_v44, %v266_v35  ;;  %v2461_v47 = vpop.f32.mrb[6].mxu0 }
 0x11d   :  { %v2462_v48 = vpop.f32.mrb[7].mxu0 }
 0x11e   :  { %v2463_v49 = vadd.f32 %v2462_v48, %v2461_v47  ;;  %v3508_v50 = vadd.f32 %v341_v46, %v14_v45 }
 0x120   :  { %v346_v52 = vadd.f32 %v2463_v49, %v271_v41  ;;  %v356_v53 = vsel %vm355_vm0, %v3508_v50, 0.0  ;;  %v3572_v49 = vld [vmem:[%s3928_s2 + $0x1f8] sm:$0xff] }
 0x121   :  { %357 = vadd.xlane.f32.xlu0 %v356_v53 }
 0x122   :  { %v3515_v54 = vadd.f32 %v346_v52, %v15_v51  ;;  %v3577_v52 = vld [vmem:[%s3928_s2 + $0x1f0] sm:$0xff] }
 0x124   :  { %v359_v55 = vsel %vm355_vm0, %v3515_v54, 0.0 }
 0x125   :  { %360 = vadd.xlane.f32.xlu0 %v359_v55 }
 0x1ae   :  { %v358_v56 = vpop.xlane.xlu0 %357 }
 0x1af   :  { %v363_v57 = vmul.f32 0.03125, %v358_v56 }
 0x1b1   :  { %v365_v58 = vsub.f32 %v3508_v50, %v363_v57 }
 0x1b2   :  { %v361_v59 = vpop.xlane.xlu0 %360 }
 0x1b3   :  { %v364_v60 = vmul.f32 0.03125, %v361_v59  ;;  %v367_v61 = vmul.f32 %v365_v58, %v365_v58 }
 0x1b5   :  { %v366_v62 = vsub.f32 %v3515_v54, %v364_v60  ;;  %v369_v63 = vsel %vm355_vm0, %v367_v61, 0.0 }
 0x1b6   :  { %370 = vadd.xlane.f32.xlu1 %v369_v63 }
 0x1b7   :  { %v368_v0 = vmul.f32 %v366_v62, %v366_v62 }
 0x1b9   :  { %v372_v1 = vsel %vm355_vm0, %v368_v0, 0.0 }
 0x1ba   :  { %373 = vadd.xlane.f32.xlu1 %v372_v1 }
 0x243   :  { %v371_v8 = vpop.xlane.xlu1 %370 }
 0x244   :  { %v375_v9 = vmul.f32 0.03125, %v371_v8 }
 0x246   :  { %v377_v10 = vadd.f32 1e-06, %v375_v9 }
 0x247   :  { %v374_v11 = vpop.xlane.xlu1 %373 }
 0x248   :  { %3092 = vrsqrt.f32 %v377_v10  ;;  %v376_v12 = vmul.f32 0.03125, %v374_v11 }
 0x24a   :  { %v378_v13 = vadd.f32 1e-06, %v376_v12 }
 0x24c   :  { %3094 = vrsqrt.f32 %v378_v13 }
 0x252   :  { %v3093_v14 = vpop.eup %3092 }
 0x253   :  { %v381_v16 = vmul.f32 %v3093_v14, %v365_v58 }
 0x255   :  { %v387_v18 = vmul.f32 %v2293_v15, %v381_v16 }
 0x256   :  { %v3095_v19 = vpop.eup %3094 }
 0x257   :  { %v382_v20 = vmul.f32 %v3095_v19, %v366_v62  ;;  %v393_v21 = vadd.f32 %v2294_v17, %v387_v18 }
 0x259   :  { %v388_v22 = vmul.f32 %v2293_v15, %v382_v20  ;;  %2584 = vmatprep.mubr.msk.f32.mxu1 %vm355_vm0, %v393_v21 }
 0x25b   :  { %v394_v23 = vadd.f32 %v2294_v17, %v388_v22 }
 0x25d   :  { %2585 = vmatmul.mubr.msk.f32.vlgmr.msra.gmra.mrb[4].mxu1 %vm355_vm0, %v394_v23 }
 0x330   :  { %v2586_v25 = vpop.f32.mrb[4].mxu1 }
 0x331   :  { %v482_v26 = vadd.f32 %v2586_v25, %v2295_v24  ;;  %v476_v27 = vpop.f32.mrb[5].mxu1 }
 0x332   :  { %v477_v28 = vadd.f32 %v2295_v24, %v476_v27  ;;  %v886_v27 = vld [vmem:[%s3928_s2 + $0x20] sm:$0xff] }
 0x334   :  { %2591 = vmatprep.mubr.msk.f32.mxu1 %vm491_vm1, %v477_v28  ;;  %v3547_v29 = vpack.i.bf16 %v482_v26, %v477_v28 }
 0x336   :  { %3058 = vrot.lane.b32.xlu1 %v3547_v29, %s3152_s28  ;;  %3053 = vrot.lane.b32.xlu0 %v3547_v29, %s3153_s29 }
 0x33a   :  { %3063 = vrot.lane.b32.xlu0 %v3547_v29, %s3154_s30 }
 0x33e   :  { %682 = vrot.lane.b32.xlu0 %v482_v26, %s3155_s4 }
 0x3a8   :  { %v3059_v30 = vpop.permute.xlu1 %3058  ;;  %v3054_v31 = vpop.permute.xlu0 %3053 }
 0x3a9   :  { %v3061_v32 = vunpack.i.h.bf16 %v3059_v30  ;;  %v3060_v33 = vunpack.i.l.bf16 %v3059_v30  ;;  %v3056_v34 = vunpack.i.h.bf16 %v3054_v31  ;;  %v3055_v35 = vunpack.i.l.bf16 %v3054_v31  ;;  %v888_v30 = vld [vmem:[%s3928_s2 + $0x30] sm:$0xff]  ;;  %v889_v31 = vld [vmem:[%s3928_s2 + $0x38] sm:$0xff] }
 0x3ab   :  { %v2890_v37 = vpack.c.bf16 %v3056_v34, %v3055_v35  ;;  %v2896_v38 = vpack.c.bf16 %v3061_v32, %v3060_v33  ;;  %v2914_v32 = vpack.c.bf16 %v889_v31, %v888_v30  ;;  %v1134_v31 = vld [vmem:[%s3928_s2 + $0xa0] sm:$0xff] }
 0x3ac   :  { %v3064_v39 = vpop.permute.xlu0 %3063 }
 0x3ad   :  { %2892 = vmatprep.subr.msk.bf16.mxu1 %vm3558_vm2, %v2890_v37  ;;  %v3066_v40 = vunpack.i.h.bf16 %v3064_v39  ;;  %v3065_v41 = vunpack.i.l.bf16 %v3064_v39 }
 0x3ae   :  { %2895 = vmatpush3.bf16.xpose.msk.msra.mxu1 %vm3558_vm2, %v2890_v37 }
 0x3af   :  { %2897 = vmatprep.subr.bf16.mxu1 %v2896_v38  ;;  %v2900_v42 = vpack.c.bf16 %v3066_v40, %v3065_v41  ;;  %v2310_v40 = vld [vmem:[%s3928_s2 + $0x20b] ss:$0 sm:$0xff] }
 0x3b0   :  { %v683_v2 = vpop.permute.xlu0 %682 }
 0x3b5   :  { %2592 = vmatmul.mubr.msk.f32.vlgmr.msra.gmra.mrb[6].mxu1 %vm491_vm1, %v482_v26 }
 0x3b6   :  { %2899 = vmatpush3.bf16.msra.mxu1 %v2896_v38 }
 0x3b7   :  { %2902 = vmatprep.subr.msk.bf16.mxu1 %vm3558_vm2, %v2900_v42 }
 0x488   :  { %v2593_v43 = vpop.f32.mrb[6].mxu1 }
 0x489   :  { %v576_v44 = vmin.f32 %v2593_v43, 80.0  ;;  %v566_v45 = vpop.f32.mrb[7].mxu1 }
 0x48a   :  { %v575_v46 = vmin.f32 %v566_v45, 80.0 }
 0x48b   :  { %v579_v47 = vmul.f32 1.442695, %v576_v44 }
 0x48c   :  { %v577_v48 = vmul.f32 1.442695, %v575_v46 }
 0x48d   :  { %3096 = vpow2.f32 %v579_v47 }
 0x48e   :  { %3098 = vpow2.f32 %v577_v48 }
 0x497   :  { %v3097_v51 = vpop.eup %3096 }
 0x498   :  { %v3099_v53 = vpop.eup %3098  ;;  %v582_v55 = vmul.f32 %v3097_v51, %v3572_v49 }
 0x499   :  { %v581_v57 = vmul.f32 %v3099_v53, %v3577_v52 }
 0x49a   :  { %v586_v56 = vsel %vm491_vm1, %v582_v55, 0.0 }
 0x49b   :  { %587 = vadd.xlane.f32.xlu1 %v586_v56  ;;  %v583_v58 = vsel %vm491_vm1, %v581_v57, 0.0 }
 0x49f   :  { %584 = vadd.xlane.f32.xlu1 %v583_v58 }
 0x4b0   :  { %680 = vrot.lane.b32.xlu1 %v477_v28, %s3155_s4  ;;  %v887_v28 = vld [vmem:[%s3928_s2 + $0x28] sm:$0xff] }
 0x528   :  { %v588_v59 = vpop.xlane.xlu1 %587 }
 0x529   :  { %3100 = vrcp.f32 %v588_v59 }
 0x52c   :  { %v585_v60 = vpop.xlane.xlu1 %584 }
 0x52d   :  { %3102 = vrcp.f32 %v585_v60 }
 0x530   :  { %v681_v1 = vpop.permute.xlu1 %680 }
 0x533   :  { %v3101_v61 = vpop.eup %3100 }
 0x534   :  { %v592_v0 = vmul.f32 %v3101_v61, %v582_v55  ;;  %v1018_v61 = vld [vmem:[%s3928_s2 + $0x40] sm:$0xff] }
 0x537   :  { %v3103_v62 = vpop.eup %3102 }
 0x538   :  { %v591_v63 = vmul.f32 %v3103_v62, %v581_v57  ;;  %v1019_v62 = vld [vmem:[%s3928_s2 + $0x48] sm:$0xff] }
 0x53a   :  { %2598 = vmatprep.mubr.msk.f32.mxu1 %vm491_vm1, %v591_v63  ;;  %v2918_v63 = vpack.c.bf16 %v1019_v62, %v1018_v61 }
 0x53b   :  { %2599 = vmatmul.mubr.msk.f32.vlgmr.msra.gmra.mrb[8].mxu1 %vm491_vm1, %v592_v0  ;;  %v1020_v0 = vld [vmem:[%s3928_s2 + $0x50] sm:$0xff] }
 0x53c   :  { %2905 = vmatpush3.bf16.xpose.msk.msra.mxu1 %vm3558_vm2, %v2900_v42  ;;  %2605 = vmatprep.mubr.msk.f32.mxu1 %vm491_vm1, %v681_v1  ;;  %v1021_v1 = vld [vmem:[%s3928_s2 + $0x58] sm:$0xff] }
 0x543   :  { %2606 = vmatmul.mubr.msk.f32.vlgmr.msra.gmra.mrb[10].mxu1 %vm491_vm1, %v683_v2  ;;  %v2922_v2 = vpack.c.bf16 %v1021_v1, %v1020_v0 }
 0x60e   :  { %v2600_v3 = vpop.f32.mrb[8].mxu1 }
 0x60f   :  { %v671_v4 = vpop.f32.mrb[9].mxu1 }
 0x616   :  { %v2607_v5 = vpop.f32.mrb[10].mxu1 }
 0x617   :  { %v772_v6 = vmin.f32 %v2607_v5, 80.0  ;;  %v762_v7 = vpop.f32.mrb[11].mxu1 }
 0x618   :  { %v771_v8 = vmin.f32 %v762_v7, 80.0 }
 0x619   :  { %v775_v9 = vmul.f32 1.442695, %v772_v6 }
 0x61a   :  { %v773_v10 = vmul.f32 1.442695, %v771_v8 }
 0x61b   :  { %3104 = vpow2.f32 %v775_v9 }
 0x61c   :  { %3106 = vpow2.f32 %v773_v10 }
 0x625   :  { %v3105_v11 = vpop.eup %3104 }
 0x626   :  { %v3107_v12 = vpop.eup %3106  ;;  %v778_v13 = vmul.f32 %v3105_v11, %v3572_v49 }
 0x627   :  { %v777_v14 = vmul.f32 %v3107_v12, %v3577_v52 }
 0x628   :  { %v782_v15 = vsel %vm491_vm1, %v778_v13, 0.0 }
 0x629   :  { %783 = vadd.xlane.f32.xlu0 %v782_v15  ;;  %v779_v16 = vsel %vm491_vm1, %v777_v14, 0.0  ;;  %v2314_v15 = vld [vmem:[%s3928_s2 + $0x20d] ss:$0 sm:$0xff] }
 0x62a   :  { %780 = vadd.xlane.f32.xlu1 %v779_v16 }
 0x63f   :  { %3068 = vrot.lane.b32.xlu0 %v3547_v29, %s3156_s9  ;;  %v2910_v29 = vpack.c.bf16 %v887_v28, %v886_v27  ;;  %v1132_v28 = vld [vmem:[%s3928_s2 + $0x90] sm:$0xff] }
 0x6b6   :  { %v784_v17 = vpop.xlane.xlu0 %783 }
 0x6b7   :  { %3108 = vrcp.f32 %v784_v17  ;;  %v781_v18 = vpop.xlane.xlu1 %780 }
 0x6b8   :  { %3110 = vrcp.f32 %v781_v18 }
 0x6ba   :  { %v3069_v19 = vpop.permute.xlu0 %3068 }
 0x6bb   :  { %v3071_v20 = vunpack.i.h.bf16 %v3069_v19  ;;  %v3070_v21 = vunpack.i.l.bf16 %v3069_v19 }
 0x6bd   :  { %v2906_v22 = vpack.c.bf16 %v3071_v20, %v3070_v21 }
 0x6bf   :  { %2907 = vmatprep.subr.bf16.mxu1 %v2906_v22 }
 0x6c0   :  { %2909 = vmatpush3.bf16.msra.mxu1 %v2906_v22  ;;  %v1128_v22 = vld [vmem:[%s3928_s2 + $0x70] sm:$0xff] }
 0x6c1   :  { %v3109_v23 = vpop.eup %3108  ;;  %2911 = vmatprep.subr.bf16.mxu1 %v2910_v29 }
 0x6c2   :  { %v3111_v24 = vpop.eup %3110  ;;  %v788_v26 = vmul.f32 %v3109_v23, %v778_v13  ;;  %v2313_v13 = vld [vmem:[%s3928_s2 + $0x20c] ss:$0 sm:$0xff]  ;;  %v1129_v23 = vld [vmem:[%s3928_s2 + $0x78] sm:$0xff] }
 0x6c3   :  { %v787_v25 = vmul.f32 %v3111_v24, %v777_v14  ;;  %v2930_v24 = vpack.c.bf16 %v1129_v23, %v1128_v22 }
 0x6c5   :  { %2612 = vmatprep.mubr.msk.f32.mxu1 %vm491_vm1, %v787_v25  ;;  %v1130_v25 = vld [vmem:[%s3928_s2 + $0x80] sm:$0xff] }
 0x6c6   :  { %2613 = vmatmul.mubr.msk.f32.vlgmr.msra.gmra.mrb[12].mxu1 %vm491_vm1, %v788_v26  ;;  %v1131_v26 = vld [vmem:[%s3928_s2 + $0x88] sm:$0xff] }
 0x6c7   :  { %2913 = vmatpush3.bf16.msra.mxu1 %v2910_v29  ;;  %v2934_v27 = vpack.c.bf16 %v1131_v26, %v1130_v25  ;;  %v1133_v29 = vld [vmem:[%s3928_s2 + $0x98] sm:$0xff]  ;;  %v1265_v25 = vld [vmem:[%s3928_s2 + $0xe8] sm:$0xff] }
 0x6c8   :  { %2915 = vmatprep.subr.bf16.mxu1 %v2914_v32  ;;  %v2938_v30 = vpack.c.bf16 %v1133_v29, %v1132_v28  ;;  %v1267_v28 = vld [vmem:[%s3928_s2 + $0xf8] sm:$0xff] }
 0x6cb   :  { %2917 = vmatpush3.bf16.msra.mxu1 %v2914_v32  ;;  %v1135_v32 = vld [vmem:[%s3928_s2 + $0xa8] sm:$0xff] }
 0x6cc   :  { %2919 = vmatprep.subr.bf16.mxu1 %v2918_v63 }
 0x799   :  { %v2614_v33 = vpop.f32.mrb[12].mxu1 }
 0x79a   :  { %v867_v34 = vpop.f32.mrb[13].mxu1 }
 0x79b   :  { %878 = vrot.lane.b32.xlu1 %v867_v34, %s3157_s16  ;;  %v1136_v34 = vld [vmem:[%s3928_s2 + $0xb0] sm:$0xff] }
 0x79f   :  { %880 = vrot.lane.b32.xlu1 %v2614_v33, %s3157_s16  ;;  %v2942_v33 = vpack.c.bf16 %v1135_v32, %v1134_v31 }
 0x80d   :  { %v879_v35 = vpop.permute.xlu1 %878 }
 0x80e   :  { %v884_v37 = vsel %vm491_vm1, %v671_v4, %v879_v35  ;;  %v1127_v4 = vld [vmem:[%s3928_s2 + $0x68] sm:$0xff]  ;;  %v1137_v35 = vld [vmem:[%s3928_s2 + $0xb8] sm:$0xff] }
 0x80f   :  { %2623 = vmatprep.mubr.msk.f32.mxu1 %vm355_vm0, %v884_v37  ;;  %v1138_v37 = vld [vmem:[%s3928_s2 + $0xc0] sm:$0xff] }
 0x811   :  { %v881_v38 = vpop.permute.xlu1 %880 }
 0x812   :  { %v885_v39 = vsel %vm491_vm1, %v2600_v3, %v881_v38  ;;  %v1126_v3 = vld [vmem:[%s3928_s2 + $0x60] sm:$0xff]  ;;  %v2946_v38 = vpack.c.bf16 %v1137_v35, %v1136_v34 }
 0x813   :  { %2624 = vmatmul.mubr.msk.f32.vlgmr.msra.gmra.mrb[14].mxu1 %vm355_vm0, %v885_v39  ;;  %v2926_v5 = vpack.c.bf16 %v1127_v4, %v1126_v3  ;;  %v1139_v39 = vld [vmem:[%s3928_s2 + $0xc8] sm:$0xff] }
 0x814   :  { %2921 = vmatpush3.bf16.msra.mxu1 %v2918_v63 }
 0x815   :  { %2923 = vmatprep.subr.bf16.mxu1 %v2922_v2  ;;  %2927 = vmatprep.subr.bf16.mxu0 %v2926_v5 }
 0x816   :  { %2929 = vmatpush3.bf16.msra.mxu0 %v2926_v5 }
 0x817   :  { %2931 = vmatprep.subr.bf16.mxu0 %v2930_v24 }
 0x818   :  { %2925 = vmatpush3.bf16.msra.mxu1 %v2922_v2 }
 0x81a   :  { %2933 = vmatpush3.bf16.msra.mxu0 %v2930_v24  ;;  %v1264_v24 = vld [vmem:[%s3928_s2 + $0xe0] sm:$0xff] }
 0x81b   :  { %2935 = vmatprep.subr.bf16.mxu0 %v2934_v27  ;;  %v2958_v26 = vpack.c.bf16 %v1265_v25, %v1264_v24 }
 0x81d   :  { %2959 = vmatprep.subr.bf16.mxu1 %v2958_v26 }
 0x81e   :  { %2937 = vmatpush3.bf16.msra.mxu0 %v2934_v27  ;;  %v1266_v27 = vld [vmem:[%s3928_s2 + $0xf0] sm:$0xff] }
 0x81f   :  { %2939 = vmatprep.subr.bf16.mxu0 %v2938_v30  ;;  %v2962_v29 = vpack.c.bf16 %v1267_v28, %v1266_v27 }
 0x822   :  { %2941 = vmatpush3.bf16.msra.mxu0 %v2938_v30 }
 0x823   :  { %2943 = vmatprep.subr.bf16.mxu0 %v2942_v33 }
 0x826   :  { %2945 = vmatpush3.bf16.msra.mxu0 %v2942_v33 }
 0x827   :  { %2947 = vmatprep.subr.bf16.mxu0 %v2946_v38 }
 0x82a   :  { %2949 = vmatpush3.bf16.msra.mxu0 %v2946_v38  ;;  %v2319_v38 = vld [vmem:[%s3928_s2 + $0x210] ss:$0 sm:$0xff] }
 0x8e6   :  { %v2625_v41 = vpop.f32.mrb[14].mxu1 }
 0x8e7   :  { %v973_v42 = vadd.f32 %v2625_v41, %v2310_v40  ;;  %v967_v43 = vpop.f32.mrb[15].mxu1  ;;  %v1140_v41 = vld [vmem:[%s3928_s2 + $0xd0] sm:$0xff] }
 0x8e8   :  { %v968_v44 = vadd.f32 %v2310_v40, %v967_v43  ;;  %v2950_v40 = vpack.c.bf16 %v1139_v39, %v1138_v37 }
 0x8e9   :  { %v3620_v45 = vadd.f32 %v973_v42, %v3515_v54  ;;  %v1141_v42 = vld [vmem:[%s3928_s2 + $0xd8] sm:$0xff] }
 0x8ea   :  { %v3623_v46 = vadd.f32 %v968_v44, %v3508_v50  ;;  %2951 = vmatprep.subr.bf16.mxu0 %v2950_v40  ;;  %v2954_v43 = vpack.c.bf16 %v1141_v42, %v1140_v41  ;;  %v2315_v44 = vld [vmem:[%s3928_s2 + $0x20e] ss:$0 sm:$0xff]  ;;  %v2320_v42 = vld [vmem:[%s3928_s2 + $0x211] ss:$0 sm:$0xff] }
 0x8eb   :  { %v983_v47 = vsel %vm355_vm0, %v3620_v45, 0.0  ;;  %2953 = vmatpush3.bf16.msra.mxu0 %v2950_v40 }
 0x8ec   :  { %984 = vadd.xlane.f32.xlu1 %v983_v47  ;;  %v980_v48 = vsel %vm355_vm0, %v3623_v46, 0.0  ;;  %2955 = vmatprep.subr.bf16.mxu0 %v2954_v43 }
 0x8ed   :  { %981 = vadd.xlane.f32.xlu0 %v980_v48 }
 0x8ef   :  { %2957 = vmatpush3.bf16.msra.mxu0 %v2954_v43 }
 0x979   :  { %v985_v51 = vpop.xlane.xlu1 %984 }
 0x97a   :  { %v987_v53 = vmul.f32 0.03125, %v985_v51  ;;  %v982_v55 = vpop.xlane.xlu0 %981 }
 0x97b   :  { %v986_v56 = vmul.f32 0.03125, %v982_v55 }
 0x97c   :  { %v989_v57 = vsub.f32 %v3620_v45, %v987_v53 }
 0x97d   :  { %v988_v54 = vsub.f32 %v3623_v46, %v986_v56 }
 0x97e   :  { %v991_v59 = vmul.f32 %v989_v57, %v989_v57 }
 0x97f   :  { %v990_v58 = vmul.f32 %v988_v54, %v988_v54 }
 0x980   :  { %v995_v60 = vsel %vm355_vm0, %v991_v59, 0.0 }
 0x981   :  { %v992_v50 = vsel %vm355_vm0, %v990_v58, 0.0 }
 0x982   :  { %993 = vadd.xlane.f32.xlu0 %v992_v50 }
 0x986   :  { %996 = vadd.xlane.f32.xlu0 %v995_v60 }
 0xa0f   :  { %v994_v6 = vpop.xlane.xlu0 %993 }
 0xa10   :  { %v998_v7 = vmul.f32 0.03125, %v994_v6 }
 0xa12   :  { %v1000_v8 = vadd.f32 1e-06, %v998_v7  ;;  %v2318_v7 = vld [vmem:[%s3928_s2 + $0x20f] ss:$0 sm:$0xff] }
 0xa13   :  { %v997_v9 = vpop.xlane.xlu0 %996 }
 0xa14   :  { %3112 = vrsqrt.f32 %v1000_v8  ;;  %v999_v10 = vmul.f32 0.03125, %v997_v9 }
 0xa16   :  { %v1001_v11 = vadd.f32 1e-06, %v999_v10 }
 0xa18   :  { %3114 = vrsqrt.f32 %v1001_v11 }
 0xa1e   :  { %v3113_v12 = vpop.eup %3112 }
 0xa1f   :  { %v1004_v14 = vmul.f32 %v3113_v12, %v988_v54 }
 0xa21   :  { %v1010_v16 = vmul.f32 %v2313_v13, %v1004_v14 }
 0xa22   :  { %v3115_v17 = vpop.eup %3114 }
 0xa23   :  { %v1005_v18 = vmul.f32 %v3115_v17, %v989_v57  ;;  %v1016_v19 = vadd.f32 %v2314_v15, %v1010_v16 }
 0xa25   :  { %v1011_v20 = vmul.f32 %v2313_v13, %v1005_v18  ;;  %2634 = vmatprep.mubr.msk.f32.mxu1 %vm355_vm0, %v1016_v19 }
 0xa27   :  { %v1017_v21 = vadd.f32 %v2314_v15, %v1011_v20 }
 0xa29   :  { %2635 = vmatmul.mubr.msk.f32.vlgmr.msra.gmra.mrb[16].mxu1 %vm355_vm0, %v1017_v21 }
 0xa2a   :  { %2961 = vmatpush3.bf16.msra.mxu1 %v2958_v26 }
 0xa2b   :  { %2963 = vmatprep.subr.bf16.mxu1 %v2962_v29 }
 0xa2e   :  { %2965 = vmatpush3.bf16.msra.mxu1 %v2962_v29 }
 0xafc   :  { %v2636_v47 = vpop.f32.mrb[16].mxu1 }
 0xafd   :  { %v1105_v48 = vadd.f32 %v2636_v47, %v2315_v44  ;;  %v1099_v51 = vpop.f32.mrb[17].mxu1 }
 0xafe   :  { %v1100_v53 = vadd.f32 %v2315_v44, %v1099_v51  ;;  %v2321_v51 = vld [vmem:[%s3928_s2 + $0x212] ss:$0 sm:$0xff] }
 0xaff   :  { %v1111_v55 = vmul.f32 0.044715, %v1105_v48  ;;  %v1109_v4 = vmul.f32 0.5, %v1105_v48 }
 0xb00   :  { %v1110_v56 = vmul.f32 0.044715, %v1100_v53  ;;  %v1108_v2 = vmul.f32 0.5, %v1100_v53 }
 0xb01   :  { %v1113_v57 = vmul.f32 %v1111_v55, %v1105_v48 }
 0xb02   :  { %v1112_v54 = vmul.f32 %v1110_v56, %v1100_v53 }
 0xb03   :  { %v1115_v58 = vmul.f32 %v1113_v57, %v1105_v48 }
 0xb04   :  { %v1114_v50 = vmul.f32 %v1112_v54, %v1100_v53 }
 0xb05   :  { %v1117_v59 = vadd.f32 %v1115_v58, %v1105_v48 }
 0xb06   :  { %v1116_v60 = vadd.f32 %v1114_v50, %v1100_v53 }
 0xb07   :  { %v1119_v61 = vmul.f32 0.7978846, %v1117_v59 }
 0xb08   :  { %v1118_v62 = vmul.f32 0.7978846, %v1116_v60 }
 0xb09   :  { %3116 = vtanh.f32 %v1119_v61 }
 0xb0a   :  { %3118 = vtanh.f32 %v1118_v62 }
 0xb13   :  { %v3117_v63 = vpop.eup %3116 }
 0xb14   :  { %v3119_v0 = vpop.eup %3118  ;;  %v1123_v1 = vadd.f32 1.0, %v3117_v63 }
 0xb15   :  { %v1122_v3 = vadd.f32 1.0, %v3119_v0 }
 0xb16   :  { %v1125_v6 = vmul.f32 %v1123_v1, %v1109_v4 }
 0xb17   :  { %v1124_v5 = vmul.f32 %v1122_v3, %v1108_v2 }
 0xb19   :  { %2669 = vmatprep.mubr.f32.mxu0 %v1124_v5 }
 0xb1a   :  { %2670 = vmatmul.mubr.f32.vlgmr.msra.gmra.mrb[8].mxu0 %v1125_v6 }
 0xbed   :  { %v2671_v8 = vpop.f32.mrb[8].mxu0 }
 0xbee   :  { %v1219_v9 = vadd.f32 %v2671_v8, %v2318_v7  ;;  %v1213_v10 = vpop.f32.mrb[9].mxu0 }
 0xbef   :  { %v1214_v11 = vadd.f32 %v2318_v7, %v1213_v10 }
 0xbf0   :  { %v3708_v12 = vadd.f32 %v1219_v9, %v3620_v45 }
 0xbf1   :  { %v3711_v13 = vadd.f32 %v1214_v11, %v3623_v46 }
 0xbf2   :  { %v1229_v14 = vsel %vm355_vm0, %v3708_v12, 0.0 }
 0xbf3   :  { %1230 = vadd.xlane.f32.xlu1 %v1229_v14  ;;  %v1226_v15 = vsel %vm355_vm0, %v3711_v13, 0.0 }
 0xbf4   :  { %1227 = vadd.xlane.f32.xlu0 %v1226_v15 }
 0xc80   :  { %v1231_v16 = vpop.xlane.xlu1 %1230 }
 0xc81   :  { %v1233_v17 = vmul.f32 0.03125, %v1231_v16  ;;  %v1228_v18 = vpop.xlane.xlu0 %1227 }
 0xc82   :  { %v1232_v19 = vmul.f32 0.03125, %v1228_v18 }
 0xc83   :  { %v1235_v20 = vsub.f32 %v3708_v12, %v1233_v17 }
 0xc84   :  { %v1234_v45 = vsub.f32 %v3711_v13, %v1232_v19 }
 0xc85   :  { %v1237_v21 = vmul.f32 %v1235_v20, %v1235_v20 }
 0xc86   :  { %v1236_v22 = vmul.f32 %v1234_v45, %v1234_v45 }
 0xc87   :  { %v1241_v46 = vsel %vm355_vm0, %v1237_v21, 0.0 }
 0xc88   :  { %1242 = vadd.xlane.f32.xlu1 %v1241_v46  ;;  %v1238_v23 = vsel %vm355_vm0, %v1236_v22, 0.0 }
 0xc89   :  { %1239 = vadd.xlane.f32.xlu0 %v1238_v23 }
 0xd15   :  { %v1243_v30 = vpop.xlane.xlu1 %1242 }
 0xd16   :  { %v1245_v31 = vmul.f32 0.03125, %v1243_v30  ;;  %v1240_v32 = vpop.xlane.xlu0 %1239 }
 0xd17   :  { %v1244_v33 = vmul.f32 0.03125, %v1240_v32 }
 0xd18   :  { %v1247_v34 = vadd.f32 1e-06, %v1245_v31 }
 0xd19   :  { %v1246_v35 = vadd.f32 1e-06, %v1244_v33 }
 0xd1a   :  { %3120 = vrsqrt.f32 %v1247_v34 }
 0xd1b   :  { %3122 = vrsqrt.f32 %v1246_v35 }
 0xd24   :  { %v3121_v37 = vpop.eup %3120 }
 0xd25   :  { %v3123_v39 = vpop.eup %3122  ;;  %v1251_v40 = vmul.f32 %v3121_v37, %v1235_v20 }
 0xd26   :  { %v1250_v41 = vmul.f32 %v3123_v39, %v1234_v45 }
 0xd27   :  { %v1257_v43 = vmul.f32 %v2319_v38, %v1251_v40 }
 0xd28   :  { %v1256_v44 = vmul.f32 %v2319_v38, %v1250_v41 }
 0xd29   :  { %v1263_v48 = vadd.f32 %v2320_v42, %v1257_v43 }
 0xd2a   :  { %v1262_v47 = vadd.f32 %v2320_v42, %v1256_v44 }
 0xd2c   :  { %2680 = vmatprep.mubr.msk.f32.mxu1 %vm355_vm0, %v1262_v47 }
 0xd2d   :  { %2681 = vmatmul.mubr.msk.f32.vlgmr.msra.gmra.mrb[18].mxu1 %vm355_vm0, %v1263_v48 }
 0xe00   :  { %v2682_v53 = vpop.f32.mrb[18].mxu1 }
 0xe01   :  { %v1351_v55 = vadd.f32 %v2682_v53, %v2321_v51  ;;  %v1345_v56 = vpop.f32.mrb[19].mxu1  ;;  %v1755_v53 = vld [vmem:[%s3928_s2 + $0x108] sm:$0xff] }
 0xe02   :  { %v1346_v57 = vadd.f32 %v2321_v51, %v1345_v56  ;;  %v1754_v51 = vld [vmem:[%s3928_s2 + $0x100] sm:$0xff]  ;;  %v1756_v56 = vld [vmem:[%s3928_s2 + $0x110] sm:$0xff] }
 0xe04   :  { %2687 = vmatprep.mubr.msk.f32.mxu1 %vm491_vm1, %v1346_v57  ;;  %v3745_v54 = vpack.i.bf16 %v1351_v55, %v1346_v57 }
 0xe06   :  { %3078 = vrot.lane.b32.xlu1 %v3745_v54, %s3152_s28  ;;  %3073 = vrot.lane.b32.xlu0 %v3745_v54, %s3153_s29 }
 0xe0a   :  { %3083 = vrot.lane.b32.xlu0 %v3745_v54, %s3154_s30 }
 0xe0e   :  { %1550 = vrot.lane.b32.xlu0 %v1351_v55, %s3155_s4 }
 0xe78   :  { %v3079_v58 = vpop.permute.xlu1 %3078  ;;  %v3074_v50 = vpop.permute.xlu0 %3073 }
 0xe79   :  { %v3081_v59 = vunpack.i.h.bf16 %v3079_v58  ;;  %v3080_v60 = vunpack.i.l.bf16 %v3079_v58  ;;  %v3076_v61 = vunpack.i.h.bf16 %v3074_v50  ;;  %v3075_v62 = vunpack.i.l.bf16 %v3074_v50 }
 0xe7b   :  { %v2966_v63 = vpack.c.bf16 %v3076_v61, %v3075_v62  ;;  %v2972_v0 = vpack.c.bf16 %v3081_v59, %v3080_v60 }
 0xe7c   :  { %v3084_v1 = vpop.permute.xlu0 %3083 }
 0xe7d   :  { %2968 = vmatprep.subr.msk.bf16.mxu1 %vm3558_vm2, %v2966_v63  ;;  %v3086_v2 = vunpack.i.h.bf16 %v3084_v1  ;;  %v3085_v3 = vunpack.i.l.bf16 %v3084_v1 }
 0xe7e   :  { %2971 = vmatpush3.bf16.xpose.msk.msra.mxu1 %vm3558_vm2, %v2966_v63  ;;  %v2336_v63 = vld [vmem:[%s3928_s2 + $0x213] ss:$0 sm:$0xff] }
 0xe7f   :  { %2973 = vmatprep.subr.bf16.mxu1 %v2972_v0  ;;  %v2976_v4 = vpack.c.bf16 %v3086_v2, %v3085_v3 }
 0xe80   :  { %v1551_v24 = vpop.permute.xlu0 %1550 }
 0xe85   :  { %2688 = vmatmul.mubr.msk.f32.vlgmr.msra.gmra.mrb[20].mxu1 %vm491_vm1, %v1351_v55  ;;  %v2986_v55 = vpack.c.bf16 %v1755_v53, %v1754_v51  ;;  %v2002_v53 = vld [vmem:[%s3928_s2 + $0x180] sm:$0xff] }
 0xe86   :  { %2975 = vmatpush3.bf16.msra.mxu1 %v2972_v0 }
 0xe87   :  { %2978 = vmatprep.subr.msk.bf16.mxu1 %vm3558_vm2, %v2976_v4  ;;  %2987 = vmatprep.subr.bf16.mxu0 %v2986_v55 }
 0xe88   :  { %2989 = vmatpush3.bf16.msra.mxu0 %v2986_v55  ;;  %v2003_v55 = vld [vmem:[%s3928_s2 + $0x188] sm:$0xff] }
 0xf58   :  { %v2689_v5 = vpop.f32.mrb[20].mxu1 }
 0xf59   :  { %v1444_v6 = vmin.f32 %v2689_v5, 80.0  ;;  %v1434_v7 = vpop.f32.mrb[21].mxu1 }
 0xf5a   :  { %v1443_v8 = vmin.f32 %v1434_v7, 80.0 }
 0xf5b   :  { %v1447_v9 = vmul.f32 1.442695, %v1444_v6 }
 0xf5c   :  { %v1445_v10 = vmul.f32 1.442695, %v1443_v8 }
 0xf5d   :  { %3124 = vpow2.f32 %v1447_v9 }
 0xf5e   :  { %3126 = vpow2.f32 %v1445_v10 }
 0xf67   :  { %v3125_v11 = vpop.eup %3124 }
 0xf68   :  { %v3127_v14 = vpop.eup %3126  ;;  %v1450_v15 = vmul.f32 %v3125_v11, %v3572_v49 }
 0xf69   :  { %v1449_v17 = vmul.f32 %v3127_v14, %v3577_v52 }
 0xf6a   :  { %v1454_v16 = vsel %vm491_vm1, %v1450_v15, 0.0 }
 0xf6b   :  { %1455 = vadd.xlane.f32.xlu1 %v1454_v16  ;;  %v1451_v18 = vsel %vm491_vm1, %v1449_v17, 0.0 }
 0xf6f   :  { %1452 = vadd.xlane.f32.xlu1 %v1451_v18  ;;  %v1886_v18 = vld [vmem:[%s3928_s2 + $0x120] sm:$0xff] }
 0xf80   :  { %1548 = vrot.lane.b32.xlu1 %v1346_v57, %s3155_s4  ;;  %v1757_v57 = vld [vmem:[%s3928_s2 + $0x118] sm:$0xff] }
 0xff8   :  { %v1456_v19 = vpop.xlane.xlu1 %1455 }
 0xff9   :  { %3128 = vrcp.f32 %v1456_v19  ;;  %v1887_v19 = vld [vmem:[%s3928_s2 + $0x128] sm:$0xff] }
 0xffc   :  { %v1453_v20 = vpop.xlane.xlu1 %1452 }
 0xffd   :  { %3130 = vrcp.f32 %v1453_v20  ;;  %v2994_v20 = vpack.c.bf16 %v1887_v19, %v1886_v18 }
0x1000   :  { %v1549_v23 = vpop.permute.xlu1 %1548 }
0x1003   :  { %v3129_v45 = vpop.eup %3128 }
0x1004   :  { %v1460_v46 = vmul.f32 %v3129_v45, %v1450_v15  ;;  %v1888_v45 = vld [vmem:[%s3928_s2 + $0x130] sm:$0xff] }
0x1007   :  { %v3131_v21 = vpop.eup %3130 }
0x1008   :  { %v1459_v22 = vmul.f32 %v3131_v21, %v1449_v17  ;;  %v1889_v21 = vld [vmem:[%s3928_s2 + $0x138] sm:$0xff] }
0x100a   :  { %2694 = vmatprep.mubr.msk.f32.mxu1 %vm491_vm1, %v1459_v22  ;;  %v2998_v22 = vpack.c.bf16 %v1889_v21, %v1888_v45 }
0x100b   :  { %2695 = vmatmul.mubr.msk.f32.vlgmr.msra.gmra.mrb[22].mxu1 %vm491_vm1, %v1460_v46  ;;  %v1994_v46 = vld [vmem:[%s3928_s2 + $0x140] sm:$0xff] }
0x100c   :  { %2981 = vmatpush3.bf16.xpose.msk.msra.mxu1 %vm3558_vm2, %v2976_v4  ;;  %2701 = vmatprep.mubr.msk.f32.mxu1 %vm491_vm1, %v1549_v23  ;;  %v1995_v23 = vld [vmem:[%s3928_s2 + $0x148] sm:$0xff] }
0x1013   :  { %2702 = vmatmul.mubr.msk.f32.vlgmr.msra.gmra.mrb[24].mxu1 %vm491_vm1, %v1551_v24  ;;  %v3002_v24 = vpack.c.bf16 %v1995_v23, %v1994_v46  ;;  %v2344_v23 = vld [vmem:[%s3928_s2 + $0x217] ss:$0 sm:$0xff] }
0x10de   :  { %v2696_v25 = vpop.f32.mrb[22].mxu1 }
0x10df   :  { %v1539_v26 = vpop.f32.mrb[23].mxu1 }
0x10e6   :  { %v2703_v27 = vpop.f32.mrb[24].mxu1 }
0x10e7   :  { %v1640_v28 = vmin.f32 %v2703_v27, 80.0  ;;  %v1630_v29 = vpop.f32.mrb[25].mxu1 }
0x10e8   :  { %v1639_v30 = vmin.f32 %v1630_v29, 80.0 }
0x10e9   :  { %v1643_v31 = vmul.f32 1.442695, %v1640_v28 }
0x10ea   :  { %v1641_v32 = vmul.f32 1.442695, %v1639_v30 }
0x10eb   :  { %3132 = vpow2.f32 %v1643_v31 }
0x10ec   :  { %3134 = vpow2.f32 %v1641_v32  ;;  %v2339_v32 = vld [vmem:[%s3928_s2 + $0x214] ss:$0 sm:$0xff] }
0x10f5   :  { %v3133_v33 = vpop.eup %3132 }
0x10f6   :  { %v3135_v34 = vpop.eup %3134  ;;  %v1646_v36 = vmul.f32 %v3133_v33, %v3572_v49 }
0x10f7   :  { %v1645_v35 = vmul.f32 %v3135_v34, %v3577_v52  ;;  %v2340_v34 = vld [vmem:[%s3928_s2 + $0x215] ss:$0 sm:$0xff] }
0x10f8   :  { %v1650_v37 = vsel %vm491_vm1, %v1646_v36, 0.0 }
0x10f9   :  { %1651 = vadd.xlane.f32.xlu0 %v1650_v37  ;;  %v1647_v38 = vsel %vm491_vm1, %v1645_v35, 0.0 }
0x10fa   :  { %1648 = vadd.xlane.f32.xlu1 %v1647_v38 }
0x110f   :  { %3088 = vrot.lane.b32.xlu0 %v3745_v54, %s3156_s9  ;;  %v2990_v54 = vpack.c.bf16 %v1757_v57, %v1756_v56  ;;  %v2004_v56 = vld [vmem:[%s3928_s2 + $0x190] sm:$0xff]  ;;  %v3018_v57 = vpack.c.bf16 %v2003_v55, %v2002_v53 }
0x1111   :  { %2991 = vmatprep.subr.bf16.mxu0 %v2990_v54 }
0x1112   :  { %2993 = vmatpush3.bf16.msra.mxu0 %v2990_v54  ;;  %v2005_v54 = vld [vmem:[%s3928_s2 + $0x198] sm:$0xff] }
0x1113   :  { %3003 = vmatprep.subr.bf16.mxu0 %v3002_v24 }
0x1186   :  { %v1652_v39 = vpop.xlane.xlu0 %1651 }
0x1187   :  { %3136 = vrcp.f32 %v1652_v39  ;;  %v1649_v40 = vpop.xlane.xlu1 %1648 }
0x1188   :  { %3138 = vrcp.f32 %v1649_v40 }
0x118a   :  { %v3089_v41 = vpop.permute.xlu0 %3088 }
0x118b   :  { %v3091_v42 = vunpack.i.h.bf16 %v3089_v41  ;;  %v3090_v43 = vunpack.i.l.bf16 %v3089_v41  ;;  %v1996_v41 = vld [vmem:[%s3928_s2 + $0x150] sm:$0xff] }
0x118d   :  { %v2982_v44 = vpack.c.bf16 %v3091_v42, %v3090_v43  ;;  %v1997_v42 = vld [vmem:[%s3928_s2 + $0x158] sm:$0xff] }
0x118e   :  { %v3006_v43 = vpack.c.bf16 %v1997_v42, %v1996_v41  ;;  %v3160_v41 = vmov 0.0  }
0x118f   :  { %2983 = vmatprep.subr.bf16.mxu1 %v2982_v44 }
0x1190   :  { %2985 = vmatpush3.bf16.msra.mxu1 %v2982_v44  ;;  %v1998_v44 = vld [vmem:[%s3928_s2 + $0x160] sm:$0xff] }
0x1191   :  { %v3137_v49 = vpop.eup %3136  ;;  %2995 = vmatprep.subr.bf16.mxu1 %v2994_v20 }
0x1192   :  { %v3139_v52 = vpop.eup %3138  ;;  %v1656_v48 = vmul.f32 %v3137_v49, %v1646_v36  ;;  %v1999_v49 = vld [vmem:[%s3928_s2 + $0x168] sm:$0xff] }
0x1193   :  { %v1655_v47 = vmul.f32 %v3139_v52, %v1645_v35  ;;  %v3010_v52 = vpack.c.bf16 %v1999_v49, %v1998_v44 }
0x1195   :  { %2708 = vmatprep.mubr.msk.f32.mxu1 %vm491_vm1, %v1655_v47  ;;  %v2000_v47 = vld [vmem:[%s3928_s2 + $0x170] sm:$0xff] }
0x1196   :  { %2709 = vmatmul.mubr.msk.f32.vlgmr.msra.gmra.mrb[26].mxu1 %vm491_vm1, %v1656_v48  ;;  %v2001_v48 = vld [vmem:[%s3928_s2 + $0x178] sm:$0xff] }
0x1197   :  { %2997 = vmatpush3.bf16.msra.mxu1 %v2994_v20  ;;  %v3014_v51 = vpack.c.bf16 %v2001_v48, %v2000_v47 }
0x1198   :  { %2999 = vmatprep.subr.bf16.mxu1 %v2998_v22 }
0x119b   :  { %3001 = vmatpush3.bf16.msra.mxu1 %v2998_v22 }
0x1269   :  { %v2710_v58 = vpop.f32.mrb[26].mxu1 }
0x126a   :  { %v1735_v50 = vpop.f32.mrb[27].mxu1 }
0x126b   :  { %1746 = vrot.lane.b32.xlu1 %v1735_v50, %s3157_s16  ;;  %v2006_v50 = vld [vmem:[%s3928_s2 + $0x1a0] sm:$0xff] }
0x126f   :  { %1748 = vrot.lane.b32.xlu1 %v2710_v58, %s3157_s16  ;;  %v3022_v58 = vpack.c.bf16 %v2005_v54, %v2004_v56 }
0x12dd   :  { %v1747_v59 = vpop.permute.xlu1 %1746 }
0x12de   :  { %v1752_v60 = vsel %vm491_vm1, %v1539_v26, %v1747_v59  ;;  %v2007_v59 = vld [vmem:[%s3928_s2 + $0x1a8] sm:$0xff] }
0x12df   :  { %2719 = vmatprep.mubr.msk.f32.mxu0 %vm355_vm0, %v1752_v60  ;;  %v3026_v60 = vpack.c.bf16 %v2007_v59, %v2006_v50 }
0x12e1   :  { %v1749_v61 = vpop.permute.xlu1 %1748 }
0x12e2   :  { %v1753_v62 = vsel %vm491_vm1, %v2696_v25, %v1749_v61  ;;  %v2008_v61 = vld [vmem:[%s3928_s2 + $0x1b0] sm:$0xff] }
0x12e3   :  { %2720 = vmatmul.mubr.msk.f32.vlgmr.msra.gmra.mrb[10].mxu0 %vm355_vm0, %v1753_v62  ;;  %v2009_v62 = vld [vmem:[%s3928_s2 + $0x1b8] sm:$0xff] }
0x12e4   :  { %3005 = vmatpush3.bf16.msra.mxu0 %v3002_v24 }
0x12e5   :  { %3007 = vmatprep.subr.bf16.mxu0 %v3006_v43 }
0x12e8   :  { %3009 = vmatpush3.bf16.msra.mxu0 %v3006_v43 }
0x12e9   :  { %3011 = vmatprep.subr.bf16.mxu0 %v3010_v52 }
0x12ec   :  { %3013 = vmatpush3.bf16.msra.mxu0 %v3010_v52 }
0x12ed   :  { %3015 = vmatprep.subr.bf16.mxu0 %v3014_v51 }
0x12f0   :  { %3017 = vmatpush3.bf16.msra.mxu0 %v3014_v51  ;;  %v2345_v51 = vld [vmem:[%s3928_s2 + $0x218] ss:$0 sm:$0xff] }
0x12f1   :  { %3019 = vmatprep.subr.bf16.mxu0 %v3018_v57 }
0x12f4   :  { %3021 = vmatpush3.bf16.msra.mxu0 %v3018_v57  ;;  %v2346_v57 = vld [vmem:[%s3928_s2 + $0x219] ss:$0 sm:$0xff] }
0x12f5   :  { %3023 = vmatprep.subr.bf16.mxu0 %v3022_v58 }
0x12f8   :  { %3025 = vmatpush3.bf16.msra.mxu0 %v3022_v58 }
0x12f9   :  { %3027 = vmatprep.subr.bf16.mxu0 %v3026_v60 }
0x12fc   :  { %3029 = vmatpush3.bf16.msra.mxu0 %v3026_v60  ;;  %v2206_v60 = vld [vmem:[%s3928_s2 + $0x1c0] sm:$0xff] }
0x13b6   :  { %v2721_v0 = vpop.f32.mrb[10].mxu0 }
0x13b7   :  { %v1841_v1 = vadd.f32 %v2721_v0, %v2336_v63  ;;  %v1835_v2 = vpop.f32.mrb[11].mxu0  ;;  %v2341_v0 = vld [vmem:[%s3928_s2 + $0x216] ss:$0 sm:$0xff] }
0x13b8   :  { %v1836_v3 = vadd.f32 %v2336_v63, %v1835_v2  ;;  %v3030_v63 = vpack.c.bf16 %v2009_v62, %v2008_v61  ;;  %v2207_v61 = vld [vmem:[%s3928_s2 + $0x1c8] sm:$0xff] }
0x13b9   :  { %v3802_v4 = vadd.f32 %v1841_v1, %v3708_v12 }
0x13ba   :  { %v3805_v5 = vadd.f32 %v1836_v3, %v3711_v13  ;;  %3031 = vmatprep.subr.bf16.mxu0 %v3030_v63 }
0x13bb   :  { %v1851_v6 = vsel %vm355_vm0, %v3802_v4, 0.0  ;;  %3033 = vmatpush3.bf16.msra.mxu0 %v3030_v63  ;;  %v2132_v63 = vld [vmem:[%s3928_s2 + $0x200] sm:$0xff] }
0x13bc   :  { %1852 = vadd.xlane.f32.xlu1 %v1851_v6  ;;  %v1848_v7 = vsel %vm355_vm0, %v3805_v5, 0.0 }
0x13bd   :  { %1849 = vadd.xlane.f32.xlu0 %v1848_v7 }
0x1449   :  { %v1853_v8 = vpop.xlane.xlu1 %1852 }
0x144a   :  { %v1855_v9 = vmul.f32 0.03125, %v1853_v8  ;;  %v1850_v10 = vpop.xlane.xlu0 %1849 }
0x144b   :  { %v1854_v11 = vmul.f32 0.03125, %v1850_v10 }
0x144c   :  { %v1857_v14 = vsub.f32 %v3802_v4, %v1855_v9 }
0x144d   :  { %v1856_v12 = vsub.f32 %v3805_v5, %v1854_v11 }
0x144e   :  { %v1859_v16 = vmul.f32 %v1857_v14, %v1857_v14 }
0x144f   :  { %v1858_v15 = vmul.f32 %v1856_v12, %v1856_v12 }
0x1450   :  { %v1863_v17 = vsel %vm355_vm0, %v1859_v16, 0.0 }
0x1451   :  { %v1860_v13 = vsel %vm355_vm0, %v1858_v15, 0.0 }
0x1452   :  { %1861 = vadd.xlane.f32.xlu0 %v1860_v13 }
0x1456   :  { %1864 = vadd.xlane.f32.xlu0 %v1863_v17 }
0x14df   :  { %v1862_v25 = vpop.xlane.xlu0 %1861 }
0x14e0   :  { %v1866_v26 = vmul.f32 0.03125, %v1862_v25 }
0x14e2   :  { %v1868_v27 = vadd.f32 1e-06, %v1866_v26 }
0x14e3   :  { %v1865_v28 = vpop.xlane.xlu0 %1864 }
0x14e4   :  { %3140 = vrsqrt.f32 %v1868_v27  ;;  %v1867_v29 = vmul.f32 0.03125, %v1865_v28 }
0x14e6   :  { %v1869_v30 = vadd.f32 1e-06, %v1867_v29 }
0x14e8   :  { %3142 = vrsqrt.f32 %v1869_v30 }
0x14ee   :  { %v3141_v31 = vpop.eup %3140 }
0x14ef   :  { %v1872_v33 = vmul.f32 %v3141_v31, %v1856_v12 }
0x14f1   :  { %v1878_v36 = vmul.f32 %v2339_v32, %v1872_v33 }
0x14f2   :  { %v3143_v35 = vpop.eup %3142 }
0x14f3   :  { %v1873_v37 = vmul.f32 %v3143_v35, %v1857_v14  ;;  %v1884_v38 = vadd.f32 %v2340_v34, %v1878_v36 }
0x14f5   :  { %v1879_v39 = vmul.f32 %v2339_v32, %v1873_v37  ;;  %2730 = vmatprep.mubr.msk.f32.mxu1 %vm355_vm0, %v1884_v38 }
0x14f7   :  { %v1885_v40 = vadd.f32 %v2340_v34, %v1879_v39 }
0x14f9   :  { %2731 = vmatmul.mubr.msk.f32.vlgmr.msra.gmra.mrb[28].mxu1 %vm355_vm0, %v1885_v40 }
0x14fa   :  { %2772 = vmatprep.mubr.msk.f32.mxu1 %vm3159_vm3, %v3160_v41 }
0x15cc   :  { %v2732_v1 = vpop.f32.mrb[28].mxu1 }
0x15cd   :  { %v1973_v2 = vadd.f32 %v2732_v1, %v2341_v0  ;;  %v1967_v3 = vpop.f32.mrb[29].mxu1  ;;  %v2208_v1 = vld [vmem:[%s3928_s2 + $0x1d0] sm:$0xff] }
0x15ce   :  { %v1968_v6 = vadd.f32 %v2341_v0, %v1967_v3  ;;  %v3038_v0 = vpack.c.bf16 %v2207_v61, %v2206_v60 }
0x15cf   :  { %v1979_v7 = vmul.f32 0.044715, %v1973_v2  ;;  %v1977_v21 = vmul.f32 0.5, %v1973_v2 }
0x15d0   :  { %v1978_v8 = vmul.f32 0.044715, %v1968_v6  ;;  %v1976_v20 = vmul.f32 0.5, %v1968_v6 }
0x15d1   :  { %v1981_v9 = vmul.f32 %v1979_v7, %v1973_v2 }
0x15d2   :  { %v1980_v10 = vmul.f32 %v1978_v8, %v1968_v6  ;;  %v2348_v8 = vld [vmem:[%s3928_s2 + $0x21a] ss:$0 sm:$0xff] }
0x15d3   :  { %v1983_v11 = vmul.f32 %v1981_v9, %v1973_v2 }
0x15d4   :  { %v1982_v14 = vmul.f32 %v1980_v10, %v1968_v6 }
0x15d5   :  { %v1985_v12 = vadd.f32 %v1983_v11, %v1973_v2  ;;  %v2209_v2 = vld [vmem:[%s3928_s2 + $0x1d8] sm:$0xff] }
0x15d6   :  { %v1984_v15 = vadd.f32 %v1982_v14, %v1968_v6  ;;  %v3041_v3 = vpack.c.bf16 %v2209_v2, %v2208_v1 }
0x15d7   :  { %v1987_v13 = vmul.f32 0.7978846, %v1985_v12 }
0x15d8   :  { %v1986_v16 = vmul.f32 0.7978846, %v1984_v15 }
0x15d9   :  { %3144 = vtanh.f32 %v1987_v13 }
0x15da   :  { %3146 = vtanh.f32 %v1986_v16 }
0x15e3   :  { %v3145_v17 = vpop.eup %3144 }
0x15e4   :  { %v3147_v18 = vpop.eup %3146  ;;  %v1991_v19 = vadd.f32 1.0, %v3145_v17 }
0x15e5   :  { %v1990_v45 = vadd.f32 1.0, %v3147_v18 }
0x15e6   :  { %v1993_v46 = vmul.f32 %v1991_v19, %v1977_v21 }
0x15e7   :  { %v1992_v22 = vmul.f32 %v1990_v45, %v1976_v20 }
0x15e9   :  { %2765 = vmatprep.mubr.f32.mxu0 %v1992_v22 }
0x15ea   :  { %2766 = vmatmul.mubr.f32.vlgmr.msra.gmra.mrb[12].mxu0 %v1993_v46 }
0x16bd   :  { %v2767_v24 = vpop.f32.mrb[12].mxu0 }
0x16be   :  { %v2087_v25 = vadd.f32 %v2767_v24, %v2344_v23  ;;  %v2081_v26 = vpop.f32.mrb[13].mxu0 }
0x16bf   :  { %v2082_v27 = vadd.f32 %v2344_v23, %v2081_v26 }
0x16c0   :  { %v2091_v28 = vadd.f32 %v2087_v25, %v3802_v4 }
0x16c1   :  { %v2090_v29 = vadd.f32 %v2082_v27, %v3805_v5  ;;  %v3158_v5 = vmov 0.0|0.0  }
0x16c2   :  { %v2097_v30 = vsel %vm355_vm0, %v2091_v28, 0.0  ;;  %3034 = vmatprep.subr.bf16.mxu1 %v3158_v5 }
0x16c3   :  { %2098 = vadd.xlane.f32.xlu1 %v2097_v30  ;;  %v2094_v31 = vsel %vm355_vm0, %v2090_v29, 0.0 }
0x16c4   :  { %2095 = vadd.xlane.f32.xlu0 %v2094_v31 }
0x1750   :  { %v2099_v32 = vpop.xlane.xlu1 %2098 }
0x1751   :  { %v2101_v33 = vmul.f32 0.03125, %v2099_v32  ;;  %v2096_v34 = vpop.xlane.xlu0 %2095 }
0x1752   :  { %v2100_v36 = vmul.f32 0.03125, %v2096_v34 }
0x1753   :  { %v2103_v35 = vsub.f32 %v2091_v28, %v2101_v33 }
0x1754   :  { %v2102_v37 = vsub.f32 %v2090_v29, %v2100_v36 }
0x1755   :  { %v2105_v38 = vmul.f32 %v2103_v35, %v2103_v35 }
0x1756   :  { %v2104_v39 = vmul.f32 %v2102_v37, %v2102_v37 }
0x1757   :  { %v2109_v40 = vsel %vm355_vm0, %v2105_v38, 0.0 }
0x1758   :  { %2110 = vadd.xlane.f32.xlu1 %v2109_v40  ;;  %v2106_v4 = vsel %vm355_vm0, %v2104_v39, 0.0 }
0x1759   :  { %2107 = vadd.xlane.f32.xlu0 %v2106_v4 }
0x17e5   :  { %v2111_v42 = vpop.xlane.xlu1 %2110 }
0x17e6   :  { %v2113_v43 = vmul.f32 0.03125, %v2111_v42  ;;  %v2108_v44 = vpop.xlane.xlu0 %2107 }
0x17e7   :  { %v2112_v49 = vmul.f32 0.03125, %v2108_v44 }
0x17e8   :  { %v2115_v52 = vadd.f32 1e-06, %v2113_v43 }
0x17e9   :  { %v2114_v47 = vadd.f32 1e-06, %v2112_v49 }
0x17ea   :  { %3148 = vrsqrt.f32 %v2115_v52 }
0x17eb   :  { %3150 = vrsqrt.f32 %v2114_v47 }
0x17f4   :  { %v3149_v48 = vpop.eup %3148 }
0x17f5   :  { %v3151_v53 = vpop.eup %3150  ;;  %v2119_v55 = vmul.f32 %v3149_v48, %v2103_v35 }
0x17f6   :  { %v2118_v56 = vmul.f32 %v3151_v53, %v2102_v37 }
0x17f7   :  { %v2125_v54 = vmul.f32 %v2345_v51, %v2119_v55 }
0x17f8   :  { %v2124_v58 = vmul.f32 %v2345_v51, %v2118_v56 }
0x17f9   :  { %v2131_v50 = vadd.f32 %v2346_v57, %v2125_v54 }
0x17fa   :  { %v2130_v59 = vadd.f32 %v2346_v57, %v2124_v58 }
0x17fc   :  { %v3035_v62 = vpack.c.bf16 %v2131_v50, %v2130_v59 }
0x17fe   :  { %3036 = vmatpush3.bf16.msra.mxu1 %v3035_v62 }
0x17ff   :  { %3037 = vmatprep.subr.bf16.mxu1 %v3158_v5 }
0x1801   :  { %2773 = vmatmul.mubr.msk.f32.vlgmr.msra.gmra.mrb[30].mxu1 %vm491_vm1, %v2132_v63 }
0x1802   :  { %3039 = vmatpush3.bf16.msra.mxu1 %v3038_v0  ;;  %2783 = vmatprep.mubr.msk.f32.mxu1 %vm3159_vm3, %v3160_v41 }
0x1803   :  { %3040 = vmatprep.subr.bf16.mxu1 %v3158_v5 }
0x1806   :  { %3042 = vmatpush3.bf16.msra.mxu1 %v3041_v3 }
0x18d4   :  { %v2202_v6 = vpop.f32.mrb[30].mxu1 }
0x18d5   :  { %v2774_v7 = vpop.f32.mrb[31].mxu1  ;;  %2784 = vmatmul.mubr.msk.f32.vlgmr.msra.gmra.mrb[32].mxu1 %vm355_vm0, %v2202_v6 }
0x19a8   :  { %v2284_v9 = vpop.f32.mrb[32].mxu1 }
0x19a9   :  { %v2285_v10 = vadd.f32 %v2348_v8, %v2284_v9  ;;  %v2785_v11 = vpop.f32.mrb[33].mxu1 }
0x19ab   :  { %2288 = vst [vmem:[%s3929_s3] sm:$0xff] %v2285_v10 }

</bundles_post_ra>
